<compile_context>
chip_gen: v7x
topology: tpu7x:2x2x1
jax: 0.10.0
libtpu: 0.0.40
codegen_flags: <defaults>
</compile_context>

<pallas_src>
import functools
import math

import jax
import jax.numpy as jnp
import numpy as np
from jax import lax
from jax.experimental import pallas as pl
from jax.experimental.pallas import tpu as pltpu


def get_nb_layers_from_res(resolution):
    assert resolution in [8, 16, 32, 64, 128]
    return int(math.log(resolution, 2) - 1)


def _round_up(x, m):
    return ((x + m - 1) // m) * m


def _pick_tm(m):
    for tm in (1024, 512, 256, 128, 64, 32, 16, 8):
        if m % tm == 0:
            return tm
    return m


# ---------------- Pallas kernels ----------------

def _proj_kernel(z_ref, w_ref, y_ref, st_ref, *, cout, sp):
    """Layer 0: dense projection z @ W0 (the 4x4 ConvT on a 1x1 input) with a fused
    per-output-channel sum / sum-of-squares epilogue for the following BatchNorm.
    Stats are computed in f32 before the bf16 store of the activation slab."""
    z = z_ref[...].astype(jnp.bfloat16)                                   # (B, latent)
    acc = jnp.dot(z, w_ref[...], preferred_element_type=jnp.float32)     # (B, sp*cout)
    s = jnp.zeros((acc.shape[0], cout), jnp.float32)
    ss = jnp.zeros((acc.shape[0], cout), jnp.float32)
    for i in range(sp):                                                   # static unroll
        blk = acc[:, i * cout:(i + 1) * cout]                            # lane-aligned
        s = s + blk
        ss = ss + blk * blk
    st_ref[0] = jnp.concatenate(
        [jnp.sum(s, axis=0, keepdims=True), jnp.sum(ss, axis=0, keepdims=True)], axis=0)
    y_ref[...] = acc.astype(y_ref.dtype)                                  # bf16 store


def _conv_phase_kernel(a_ref, w_ref, y_ref, *stats_refs, activation, need_stats, cout):
    """One (phase, M-tile) step of a stride-2 ConvTranspose:
       matmul   : bf16 patches x bf16 weights, f32 accumulation on the MXU
       epilogue : f32 per-channel sum/sumsq for the next BN (computed before any cast),
                  then slice to the valid Cout columns, optional tanh, bf16/f32 store."""
    acc = jnp.dot(a_ref[0], w_ref[0], preferred_element_type=jnp.float32)  # (TM, Coutp)
    if need_stats:
        stats_refs[0][0] = jnp.concatenate(
            [jnp.sum(acc, axis=0, keepdims=True),
             jnp.sum(acc * acc, axis=0, keepdims=True)], axis=0)
    out = acc[:, :cout]                            # drop 128-lane padding columns
    if activation == "tanh":
        out = jnp.tanh(out)
    y_ref[0] = out.astype(y_ref.dtype)


# ---------------- pallas_call wrappers ----------------

def proj_layer(z2d, w0_slab, cout):
    B, latent = z2d.shape
    n_cols = w0_slab.shape[1]                 # 16 * cout
    sp = 16                                   # spatial positions per lane tile
    for cand in (4, 8, 16):
        if (cand * cout) % 128 == 0:
            sp = cand
            break
    tn = sp * cout
    n_n = n_cols // tn
    y, st = pl.pallas_call(
        functools.partial(_proj_kernel, cout=cout, sp=sp),
        out_shape=(jax.ShapeDtypeStruct((B, n_cols), jnp.bfloat16),
                   jax.ShapeDtypeStruct((n_n, 2, cout), jnp.float32)),
        grid=(n_n,),
        in_specs=[pl.BlockSpec((B, latent), lambda j: (0, 0)),
                  pl.BlockSpec((latent, tn), lambda j: (0, j))],
        out_specs=(pl.BlockSpec((B, tn), lambda j: (0, j)),
                   pl.BlockSpec((1, 2, cout), lambda j: (j, 0, 0))),
        compiler_params=pltpu.CompilerParams(
            dimension_semantics=("parallel",),
            vmem_limit_bytes=32 * 1024 * 1024),
    )(z2d, w0_slab)
    return y, st


def conv_phase_layer(a_all, w_all, *, cout, activation="none", need_stats=True):
    n_ph, m, k = a_all.shape
    coutp = w_all.shape[2]
    tm = _pick_tm(m)
    n_m = m // tm
    out_dtype = jnp.float32 if activation == "tanh" else jnp.bfloat16
    in_specs = [
        pl.BlockSpec((1, tm, k), lambda p, t: (p, t, 0)),
        pl.BlockSpec((1, k, coutp), lambda p, t: (p, 0, 0)),
    ]
    out_shape = [jax.ShapeDtypeStruct((n_ph, m, cout), out_dtype)]
    out_specs = [pl.BlockSpec((1, tm, cout), lambda p, t: (p, t, 0))]
    if need_stats:
        out_shape.append(jax.ShapeDtypeStruct((n_ph * n_m, 2, coutp), jnp.float32))
        out_specs.append(
            pl.BlockSpec((1, 2, coutp), lambda p, t: (p * n_m + t, 0, 0)))
    res = pl.pallas_call(
        functools.partial(_conv_phase_kernel, activation=activation,
                          need_stats=need_stats, cout=cout),
        out_shape=tuple(out_shape),
        grid=(n_ph, n_m),
        in_specs=in_specs,
        out_specs=tuple(out_specs),
        compiler_params=pltpu.CompilerParams(
            dimension_semantics=("parallel", "parallel"),
            vmem_limit_bytes=32 * 1024 * 1024),
    )(a_all, w_all)
    return res if need_stats else res[0]


# ---------------- layout glue (plain JAX) ----------------

def _assemble_phases(y_all, B, H, W, cout):
    """(4, B*H*W, cout) phase outputs -> (B, 2H, 2W, cout) NHWC."""
    y = y_all.reshape(2, 2, B, H, W, cout)                     # (ry, rx, b, y, x, c)
    y = jnp.transpose(y, (2, 3, 0, 4, 1, 5))                   # (b, y, ry, x, rx, c)
    return y.reshape(B, 2 * H, 2 * W, cout)


def _bn_relu(act, stats, gamma, beta, count):
    """Training-mode BatchNorm (eps=1e-5, biased variance from fused sum/sumsq stats)
    + ReLU applied once over the assembled activation; returns bf16."""
    mean = stats[0] / count
    var = stats[1] / count - mean * mean
    scale = gamma * lax.rsqrt(var + 1e-5)
    shift = beta - mean * scale
    x = jnp.maximum(act.astype(jnp.float32) * scale + shift, 0.0)
    return x.astype(jnp.bfloat16)


def _phase_patches(xn):
    """Zero-pad the normalized bf16 activation and build the per-phase 2x2-tap im2col
    matrices: (B,H,W,C) -> (4, B*H*W, 4C) bf16, column order (tap, c)."""
    B, H, W, C = xn.shape
    padded = jnp.pad(xn, ((0, 0), (1, 1), (1, 1), (0, 0)))
    phases = []
    for ry in (0, 1):
        for rx in (0, 1):
            taps = [padded[:, ry + dy:ry + dy + H, rx + dx:rx + dx + W, :]
                    for dy in (0, 1) for dx in (0, 1)]
            phases.append(jnp.stack(taps, axis=3).reshape(B * H * W, 4 * C))
    return jnp.stack(phases, axis=0)                           # (4, B*H*W, 4C) bf16


# ---------------- precomputed weight slabs ----------------

def _proj_weight_slab(w):
    """(Cin, Cout, 4, 4) -> (Cin, 16*Cout) bf16, column order (i, j, co)."""
    cin, cout, kh, kw = w.shape
    return jnp.transpose(w, (0, 2, 3, 1)).reshape(cin, kh * kw * cout).astype(jnp.bfloat16)


def _phase_weight_slabs(w):
    """Stride-2, k=4, p=1 ConvTranspose -> 4 sub-pixel phases with 2x2 taps each.
    slab[2*ry+rx][(2*dy+dx)*Cin + ci, co] = W[ci, co, 3-(2*dy+ry), 3-(2*dx+rx)]."""
    cin, cout, _, _ = w.shape
    coutp = _round_up(cout, 128)
    slabs = []
    for ry in (0, 1):
        for rx in (0, 1):
            taps = [w[:, :, 3 - (2 * dy + ry), 3 - (2 * dx + rx)]
                    for dy in (0, 1) for dx in (0, 1)]
            mat = jnp.concatenate(taps, axis=0)                # (4*Cin, Cout)
            if coutp != cout:
                mat = jnp.pad(mat, ((0, 0), (0, coutp - cout)))
            slabs.append(mat)
    return jnp.stack(slabs, axis=0).astype(jnp.bfloat16)       # (4, 4*Cin, Coutp)


# ---------------- Generator ----------------

class Generator:
    """JAX/Pallas port of the DCGAN-style PyTorch Generator (forward of the freshly
    constructed module, i.e. BatchNorm in default training mode, eps=1e-5)."""

    def __init__(self, key, latent_dim=16, img_channels=1, img_res=32, feature_map_size=32):
        self.latent_dim = latent_dim
        self.img_channels = img_channels
        self.img_res = img_res
        self.nb_layers = get_nb_layers_from_res(img_res)
        self.feature_map_size = feature_map_size

        self.conv_weights_raw = []      # PyTorch-layout (Cin, Cout, 4, 4), N(0, 0.02)
        self.conv_cfgs = []             # (stride, padding) -- used by the reference
        self.bn_params = []             # (gamma ~ N(1, 0.02), beta = 0)
        self.layer_couts = []

        out_channels = int(self.feature_map_size * img_res / 4)
        key, k = jax.random.split(key)
        self.conv_weights_raw.append(
            0.02 * jax.random.normal(k, (latent_dim, out_channels, 4, 4), jnp.float32))
        self.conv_cfgs.append((1, 0))
        self.layer_couts.append(out_channels)
        for i_layer in reversed(range(self.nb_layers - 1)):
            key, kg = jax.random.split(key)
            gamma = 1.0 + 0.02 * jax.random.normal(kg, (out_channels,), jnp.float32)
            beta = jnp.zeros((out_channels,), jnp.float32)
            self.bn_params.append((gamma, beta))
            in_channels = out_channels
            out_channels = int(out_channels / 2)
            oc = out_channels if i_layer != 0 else self.img_channels
            key, kw = jax.random.split(key)
            self.conv_weights_raw.append(
                0.02 * jax.random.normal(kw, (in_channels, oc, 4, 4), jnp.float32))
            self.conv_cfgs.append((2, 1))
            self.layer_couts.append(oc)

        # DMA-ready bf16 weight slabs, computed once at construction.
        self.w0_slab = _proj_weight_slab(self.conv_weights_raw[0])
        self.phase_slabs = [_phase_weight_slabs(w) for w in self.conv_weights_raw[1:]]

    def __call__(self, z_nchw):
        B = z_nchw.shape[0]
        z2d = z_nchw.reshape(B, self.latent_dim).astype(jnp.float32)

        cout0 = self.layer_couts[0]
        y, st = proj_layer(z2d, self.w0_slab, cout0)
        act = y.reshape(B, 4, 4, cout0)                        # NHWC, bf16
        stats = jnp.sum(st, axis=0)                            # (2, cout0) f32
        H = W = 4
        count = B * H * W

        n = len(self.conv_weights_raw)
        for li in range(1, n):
            gamma, beta = self.bn_params[li - 1]
            xn = _bn_relu(act, stats, gamma, beta, count)      # BN + ReLU once, bf16
            a_all = _phase_patches(xn)                         # bf16 im2col phases
            cout = self.layer_couts[li]
            is_last = li == n - 1
            if is_last:
                y_all = conv_phase_layer(a_all, self.phase_slabs[li - 1], cout=cout,
                                         activation="tanh", need_stats=False)
            else:
                y_all, st_all = conv_phase_layer(a_all, self.phase_slabs[li - 1],
                                                 cout=cout, activation="none",
                                                 need_stats=True)
                stats = jnp.sum(st_all, axis=0)[:, :cout]
            act = _assemble_phases(y_all, B, H, W, cout)
            H, W = 2 * H, 2 * W
            count = B * H * W
        return jnp.transpose(act, (0, 3, 1, 2))                # NHWC -> NCHW (f32)


# ---------------- independent reference (lax.conv) for a numerical sanity check ----------------

def reference_forward(gen, z_nchw):
    x = jnp.transpose(z_nchw.astype(jnp.float32), (0, 2, 3, 1))
    n = len(gen.conv_weights_raw)
    for li in range(n):
        if li > 0:
            gamma, beta = gen.bn_params[li - 1]
            mean = jnp.mean(x, axis=(0, 1, 2), keepdims=True)
            var = jnp.mean(jnp.square(x - mean), axis=(0, 1, 2), keepdims=True)
            x = jnp.maximum((x - mean) * lax.rsqrt(var + 1e-5) * gamma + beta, 0.0)
        w = gen.conv_weights_raw[li]
        stride, padding = gen.conv_cfgs[li]
        pd = 4 - 1 - padding
        w_hwio = jnp.transpose(w[:, :, ::-1, ::-1], (2, 3, 0, 1))
        x = lax.conv_general_dilated(
            x.astype(jnp.bfloat16), w_hwio.astype(jnp.bfloat16),
            window_strides=(1, 1), padding=[(pd, pd), (pd, pd)],
            lhs_dilation=(stride, stride),
            dimension_numbers=("NHWC", "HWIO", "NHWC"),
            preferred_element_type=jnp.float32)
        if li == n - 1:
            x = jnp.tanh(x)
    return jnp.transpose(x, (0, 3, 1, 2))


if __name__ == "__main__":
    key = jax.random.PRNGKey(0)
    pkey, zkey = jax.random.split(key)
    gen = Generator(pkey, latent_dim=16, img_channels=1, img_res=32, feature_map_size=32)

    batch_size = 2
    z = jax.random.normal(zkey, (batch_size, gen.latent_dim, 1, 1), jnp.float32)

    forward = jax.jit(gen.__call__)
    img = jax.block_until_ready(forward(z))
    assert img.shape == (batch_size, gen.img_channels, gen.img_res, gen.img_res), img.shape

    ref = jax.block_until_ready(reference_forward(gen, z))
    # bf16 MXU operands and bf16 activation streams (in both paths) => looser tolerance
    # than a pure-f32 check.
    np.testing.assert_allclose(np.asarray(img), np.asarray(ref), rtol=3e-2, atol=3e-2)

    print("KERNEL_OK")
</pallas_src>

<mosaic_0001>
module attributes {stable_mosaic.version = 11 : i64} {
  func.func @_proj_kernel(%arg0: i32, %arg1: memref<2x16xf32, #tpu.memory_space<vmem>>, %arg2: memref<16x1024xbf16, #tpu.memory_space<vmem>>, %arg3: memref<2x1024xbf16, #tpu.memory_space<vmem>>, %arg4: memref<1x2x256xf32, #tpu.memory_space<vmem>>) attributes {dimension_semantics = [#tpu.dimension_semantics<parallel>], iteration_bounds = array<i64: 4>, scalar_prefetch = 0 : i64, scratch_operands = 0 : i64, tpu.core_type = #tpu.core_type<tc>, window_params = [{pipeline_mode = #tpu.pipeline_mode<synchronous>, transform_indices = @transform_0, window_bounds = array<i64: 2, 16>}, {transform_indices = @transform_1, window_bounds = array<i64: 16, 1024>}, {transform_indices = @transform_2, window_bounds = array<i64: 2, 1024>}, {transform_indices = @transform_3, window_bounds = array<i64: 1, 2, 256>}]} {
    %c0 = arith.constant 0 : index
    %c0_0 = arith.constant 0 : index
    %0 = vector.load %arg1[%c0, %c0_0] : memref<2x16xf32, #tpu.memory_space<vmem>>, vector<2x16xf32>
    %1 = arith.truncf %0 : vector<2x16xf32> to vector<2x16xbf16>
    %c0_1 = arith.constant 0 : index
    %c0_2 = arith.constant 0 : index
    %2 = vector.load %arg2[%c0_1, %c0_2] : memref<16x1024xbf16, #tpu.memory_space<vmem>>, vector<16x1024xbf16>
    %cst = arith.constant dense<0.000000e+00> : vector<2x1024xf32>
    %3 = tpu.matmul %1, %2, %cst {dimension_numbers = #tpu.dot_dimension_numbers<[1], [0], [0], [1], [0, 0, 1, 1], [], []>} : vector<2x16xbf16>, vector<16x1024xbf16>, vector<2x1024xf32> -> vector<2x1024xf32>
    %cst_3 = arith.constant 0.000000e+00 : f32
    %4 = vector.broadcast %cst_3 : f32 to vector<2x256xf32>
    %cst_4 = arith.constant 0.000000e+00 : f32
    %5 = vector.broadcast %cst_4 : f32 to vector<2x256xf32>
    %6 = vector.extract_strided_slice %3 {offsets = [0, 0], sizes = [2, 256], strides = [1, 1]} : vector<2x1024xf32> to vector<2x256xf32>
    %7 = arith.addf %4, %6 : vector<2x256xf32>
    %8 = arith.mulf %6, %6 : vector<2x256xf32>
    %9 = arith.addf %5, %8 : vector<2x256xf32>
    %10 = vector.extract_strided_slice %3 {offsets = [0, 256], sizes = [2, 256], strides = [1, 1]} : vector<2x1024xf32> to vector<2x256xf32>
    %11 = arith.addf %7, %10 : vector<2x256xf32>
    %12 = arith.mulf %10, %10 : vector<2x256xf32>
    %13 = arith.addf %9, %12 : vector<2x256xf32>
    %14 = vector.extract_strided_slice %3 {offsets = [0, 512], sizes = [2, 256], strides = [1, 1]} : vector<2x1024xf32> to vector<2x256xf32>
    %15 = arith.addf %11, %14 : vector<2x256xf32>
    %16 = arith.mulf %14, %14 : vector<2x256xf32>
    %17 = arith.addf %13, %16 : vector<2x256xf32>
    %18 = vector.extract_strided_slice %3 {offsets = [0, 768], sizes = [2, 256], strides = [1, 1]} : vector<2x1024xf32> to vector<2x256xf32>
    %19 = arith.addf %15, %18 : vector<2x256xf32>
    %20 = arith.mulf %18, %18 : vector<2x256xf32>
    %21 = arith.addf %17, %20 : vector<2x256xf32>
    %cst_5 = arith.constant dense<0.000000e+00> : vector<256xf32>
    %22 = vector.multi_reduction <add>, %19, %cst_5 [0] : vector<2x256xf32> to vector<256xf32>
    %23 = vector.shape_cast %22 : vector<256xf32> to vector<1x256xf32>
    %cst_6 = arith.constant dense<0.000000e+00> : vector<256xf32>
    %24 = vector.multi_reduction <add>, %21, %cst_6 [0] : vector<2x256xf32> to vector<256xf32>
    %25 = vector.shape_cast %24 : vector<256xf32> to vector<1x256xf32>
    %26 = tpu.concatenate %23, %25 in 0 : vector<1x256xf32>, vector<1x256xf32> -> vector<2x256xf32>
    %c0_7 = arith.constant 0 : index
    %c0_8 = arith.constant 0 : index
    %c0_9 = arith.constant 0 : index
    %27 = vector.load %arg4[%c0_7, %c0_8, %c0_9] : memref<1x2x256xf32, #tpu.memory_space<vmem>>, vector<1x2x256xf32>
    %28 = vector.shape_cast %27 : vector<1x2x256xf32> to vector<2x256xf32>
    %29 = vector.shape_cast %26 : vector<2x256xf32> to vector<1x2x256xf32>
    tpu.vector_store %arg4[%c0_7, %c0_8, %c0_9], %29 {strides = array<i32>} : memref<1x2x256xf32, #tpu.memory_space<vmem>>, vector<1x2x256xf32>,
    %30 = arith.truncf %3 : vector<2x1024xf32> to vector<2x1024xbf16>
    %c0_10 = arith.constant 0 : index
    %c0_11 = arith.constant 0 : index
    %31 = vector.load %arg3[%c0_10, %c0_11] : memref<2x1024xbf16, #tpu.memory_space<vmem>>, vector<2x1024xbf16>
    tpu.vector_store %arg3[%c0_10, %c0_11], %30 {strides = array<i32>} : memref<2x1024xbf16, #tpu.memory_space<vmem>>, vector<2x1024xbf16>,
    return
  }
  func.func @transform_0(%arg0: i32) -> (i32, i32) {
    %c0_i32 = arith.constant 0 : i32
    %c0_i32_0 = arith.constant 0 : i32
    %c0_i32_1 = arith.constant 0 : i32
    return %c0_i32, %c0_i32_0 : i32, i32
  }
  func.func @transform_1(%arg0: i32) -> (i32, i32) {
    %c0_i32 = arith.constant 0 : i32
    %c0_i32_0 = arith.constant 0 : i32
    return %c0_i32, %arg0 : i32, i32
  }
  func.func @transform_2(%arg0: i32) -> (i32, i32) {
    %c0_i32 = arith.constant 0 : i32
    %c0_i32_0 = arith.constant 0 : i32
    return %c0_i32, %arg0 : i32, i32
  }
  func.func @transform_3(%arg0: i32) -> (i32, i32, i32) {
    %c0_i32 = arith.constant 0 : i32
    %c0_i32_0 = arith.constant 0 : i32
    %c0_i32_1 = arith.constant 0 : i32
    return %arg0, %c0_i32, %c0_i32_0 : i32, i32, i32
  }
}

module attributes {stable_mosaic.version = 11 : i64} {
  func.func @_conv_phase_kernel(%arg0: i32, %arg1: i32, %arg2: memref<1x32x1024xbf16, #tpu.memory_space<vmem>>, %arg3: memref<1x1024x128xbf16, #tpu.memory_space<vmem>>, %arg4: memref<1x32x128xbf16, #tpu.memory_space<vmem>>, %arg5: memref<1x2x128xf32, #tpu.memory_space<vmem>>) attributes {dimension_semantics = [#tpu.dimension_semantics<parallel>, #tpu.dimension_semantics<parallel>], iteration_bounds = array<i64: 4, 1>, scalar_prefetch = 0 : i64, scratch_operands = 0 : i64, tpu.core_type = #tpu.core_type<tc>, window_params = [{transform_indices = @transform_0, window_bounds = array<i64: 1, 32, 1024>}, {transform_indices = @transform_1, window_bounds = array<i64: 1, 1024, 128>}, {transform_indices = @transform_2, window_bounds = array<i64: 1, 32, 128>}, {transform_indices = @transform_3, window_bounds = array<i64: 1, 2, 128>}]} {
    %c0 = arith.constant 0 : index
    %c0_0 = arith.constant 0 : index
    %c0_1 = arith.constant 0 : index
    %0 = vector.load %arg2[%c0, %c0_0, %c0_1] : memref<1x32x1024xbf16, #tpu.memory_space<vmem>>, vector<1x32x1024xbf16>
    %1 = vector.shape_cast %0 : vector<1x32x1024xbf16> to vector<32x1024xbf16>
    %c0_2 = arith.constant 0 : index
    %c0_3 = arith.constant 0 : index
    %c0_4 = arith.constant 0 : index
    %2 = vector.load %arg3[%c0_2, %c0_3, %c0_4] : memref<1x1024x128xbf16, #tpu.memory_space<vmem>>, vector<1x1024x128xbf16>
    %3 = vector.shape_cast %2 : vector<1x1024x128xbf16> to vector<1024x128xbf16>
    %cst = arith.constant dense<0.000000e+00> : vector<32x128xf32>
    %4 = tpu.matmul %1, %3, %cst {dimension_numbers = #tpu.dot_dimension_numbers<[1], [0], [0], [1], [0, 0, 1, 1], [], []>} : vector<32x1024xbf16>, vector<1024x128xbf16>, vector<32x128xf32> -> vector<32x128xf32>
    %cst_5 = arith.constant dense<0.000000e+00> : vector<128xf32>
    %5 = vector.multi_reduction <add>, %4, %cst_5 [0] : vector<32x128xf32> to vector<128xf32>
    %6 = vector.shape_cast %5 : vector<128xf32> to vector<1x128xf32>
    %7 = arith.mulf %4, %4 : vector<32x128xf32>
    %cst_6 = arith.constant dense<0.000000e+00> : vector<128xf32>
    %8 = vector.multi_reduction <add>, %7, %cst_6 [0] : vector<32x128xf32> to vector<128xf32>
    %9 = vector.shape_cast %8 : vector<128xf32> to vector<1x128xf32>
    %10 = tpu.concatenate %6, %9 in 0 : vector<1x128xf32>, vector<1x128xf32> -> vector<2x128xf32>
    %c0_7 = arith.constant 0 : index
    %c0_8 = arith.constant 0 : index
    %c0_9 = arith.constant 0 : index
    %11 = vector.load %arg5[%c0_7, %c0_8, %c0_9] : memref<1x2x128xf32, #tpu.memory_space<vmem>>, vector<1x2x128xf32>
    %12 = vector.shape_cast %11 : vector<1x2x128xf32> to vector<2x128xf32>
    %13 = vector.shape_cast %10 : vector<2x128xf32> to vector<1x2x128xf32>
    tpu.vector_store %arg5[%c0_7, %c0_8, %c0_9], %13 {strides = array<i32>} : memref<1x2x128xf32, #tpu.memory_space<vmem>>, vector<1x2x128xf32>,
    %14 = arith.truncf %4 : vector<32x128xf32> to vector<32x128xbf16>
    %c0_10 = arith.constant 0 : index
    %c0_11 = arith.constant 0 : index
    %c0_12 = arith.constant 0 : index
    %15 = vector.load %arg4[%c0_10, %c0_11, %c0_12] : memref<1x32x128xbf16, #tpu.memory_space<vmem>>, vector<1x32x128xbf16>
    %16 = vector.shape_cast %15 : vector<1x32x128xbf16> to vector<32x128xbf16>
    %17 = vector.shape_cast %14 : vector<32x128xbf16> to vector<1x32x128xbf16>
    tpu.vector_store %arg4[%c0_10, %c0_11, %c0_12], %17 {strides = array<i32>} : memref<1x32x128xbf16, #tpu.memory_space<vmem>>, vector<1x32x128xbf16>,
    return
  }
  func.func @transform_0(%arg0: i32, %arg1: i32) -> (i32, i32, i32) {
    %c0_i32 = arith.constant 0 : i32
    %c0_i32_0 = arith.constant 0 : i32
    return %arg0, %arg1, %c0_i32 : i32, i32, i32
  }
  func.func @transform_1(%arg0: i32, %arg1: i32) -> (i32, i32, i32) {
    %c0_i32 = arith.constant 0 : i32
    %c0_i32_0 = arith.constant 0 : i32
    %c0_i32_1 = arith.constant 0 : i32
    return %arg0, %c0_i32, %c0_i32_0 : i32, i32, i32
  }
  func.func @transform_2(%arg0: i32, %arg1: i32) -> (i32, i32, i32) {
    %c0_i32 = arith.constant 0 : i32
    %c0_i32_0 = arith.constant 0 : i32
    return %arg0, %arg1, %c0_i32 : i32, i32, i32
  }
  func.func @transform_3(%arg0: i32, %arg1: i32) -> (i32, i32, i32) {
    %c1_i32 = arith.constant 1 : i32
    %0 = arith.muli %arg0, %c1_i32 : i32
    %1 = arith.addi %0, %arg1 : i32
    %c0_i32 = arith.constant 0 : i32
    %c0_i32_0 = arith.constant 0 : i32
    %c0_i32_1 = arith.constant 0 : i32
    return %1, %c0_i32, %c0_i32_0 : i32, i32, i32
  }
}

module attributes {stable_mosaic.version = 11 : i64} {
  func.func @_conv_phase_kernel(%arg0: i32, %arg1: i32, %arg2: memref<1x128x512xbf16, #tpu.memory_space<vmem>>, %arg3: memref<1x512x128xbf16, #tpu.memory_space<vmem>>, %arg4: memref<1x128x64xbf16, #tpu.memory_space<vmem>>, %arg5: memref<1x2x128xf32, #tpu.memory_space<vmem>>) attributes {dimension_semantics = [#tpu.dimension_semantics<parallel>, #tpu.dimension_semantics<parallel>], iteration_bounds = array<i64: 4, 1>, scalar_prefetch = 0 : i64, scratch_operands = 0 : i64, tpu.core_type = #tpu.core_type<tc>, window_params = [{transform_indices = @transform_0, window_bounds = array<i64: 1, 128, 512>}, {transform_indices = @transform_1, window_bounds = array<i64: 1, 512, 128>}, {transform_indices = @transform_2, window_bounds = array<i64: 1, 128, 64>}, {transform_indices = @transform_3, window_bounds = array<i64: 1, 2, 128>}]} {
    %c0 = arith.constant 0 : index
    %c0_0 = arith.constant 0 : index
    %c0_1 = arith.constant 0 : index
    %0 = vector.load %arg2[%c0, %c0_0, %c0_1] : memref<1x128x512xbf16, #tpu.memory_space<vmem>>, vector<1x128x512xbf16>
    %1 = vector.shape_cast %0 : vector<1x128x512xbf16> to vector<128x512xbf16>
    %c0_2 = arith.constant 0 : index
    %c0_3 = arith.constant 0 : index
    %c0_4 = arith.constant 0 : index
    %2 = vector.load %arg3[%c0_2, %c0_3, %c0_4] : memref<1x512x128xbf16, #tpu.memory_space<vmem>>, vector<1x512x128xbf16>
    %3 = vector.shape_cast %2 : vector<1x512x128xbf16> to vector<512x128xbf16>
    %cst = arith.constant dense<0.000000e+00> : vector<128x128xf32>
    %4 = tpu.matmul %1, %3, %cst {dimension_numbers = #tpu.dot_dimension_numbers<[1], [0], [0], [1], [0, 0, 1, 1], [], []>} : vector<128x512xbf16>, vector<512x128xbf16>, vector<128x128xf32> -> vector<128x128xf32>
    %cst_5 = arith.constant dense<0.000000e+00> : vector<128xf32>
    %5 = vector.multi_reduction <add>, %4, %cst_5 [0] : vector<128x128xf32> to vector<128xf32>
    %6 = vector.shape_cast %5 : vector<128xf32> to vector<1x128xf32>
    %7 = arith.mulf %4, %4 : vector<128x128xf32>
    %cst_6 = arith.constant dense<0.000000e+00> : vector<128xf32>
    %8 = vector.multi_reduction <add>, %7, %cst_6 [0] : vector<128x128xf32> to vector<128xf32>
    %9 = vector.shape_cast %8 : vector<128xf32> to vector<1x128xf32>
    %10 = tpu.concatenate %6, %9 in 0 : vector<1x128xf32>, vector<1x128xf32> -> vector<2x128xf32>
    %c0_7 = arith.constant 0 : index
    %c0_8 = arith.constant 0 : index
    %c0_9 = arith.constant 0 : index
    %11 = vector.load %arg5[%c0_7, %c0_8, %c0_9] : memref<1x2x128xf32, #tpu.memory_space<vmem>>, vector<1x2x128xf32>
    %12 = vector.shape_cast %11 : vector<1x2x128xf32> to vector<2x128xf32>
    %13 = vector.shape_cast %10 : vector<2x128xf32> to vector<1x2x128xf32>
    tpu.vector_store %arg5[%c0_7, %c0_8, %c0_9], %13 {strides = array<i32>} : memref<1x2x128xf32, #tpu.memory_space<vmem>>, vector<1x2x128xf32>,
    %14 = vector.extract_strided_slice %4 {offsets = [0, 0], sizes = [128, 64], strides = [1, 1]} : vector<128x128xf32> to vector<128x64xf32>
    %15 = arith.truncf %14 : vector<128x64xf32> to vector<128x64xbf16>
    %c0_10 = arith.constant 0 : index
    %c0_11 = arith.constant 0 : index
    %c0_12 = arith.constant 0 : index
    %16 = vector.load %arg4[%c0_10, %c0_11, %c0_12] : memref<1x128x64xbf16, #tpu.memory_space<vmem>>, vector<1x128x64xbf16>
    %17 = vector.shape_cast %16 : vector<1x128x64xbf16> to vector<128x64xbf16>
    %18 = vector.shape_cast %15 : vector<128x64xbf16> to vector<1x128x64xbf16>
    tpu.vector_store %arg4[%c0_10, %c0_11, %c0_12], %18 {strides = array<i32>} : memref<1x128x64xbf16, #tpu.memory_space<vmem>>, vector<1x128x64xbf16>,
    return
  }
  func.func @transform_0(%arg0: i32, %arg1: i32) -> (i32, i32, i32) {
    %c0_i32 = arith.constant 0 : i32
    %c0_i32_0 = arith.constant 0 : i32
    return %arg0, %arg1, %c0_i32 : i32, i32, i32
  }
  func.func @transform_1(%arg0: i32, %arg1: i32) -> (i32, i32, i32) {
    %c0_i32 = arith.constant 0 : i32
    %c0_i32_0 = arith.constant 0 : i32
    %c0_i32_1 = arith.constant 0 : i32
    return %arg0, %c0_i32, %c0_i32_0 : i32, i32, i32
  }
  func.func @transform_2(%arg0: i32, %arg1: i32) -> (i32, i32, i32) {
    %c0_i32 = arith.constant 0 : i32
    %c0_i32_0 = arith.constant 0 : i32
    return %arg0, %arg1, %c0_i32 : i32, i32, i32
  }
  func.func @transform_3(%arg0: i32, %arg1: i32) -> (i32, i32, i32) {
    %c1_i32 = arith.constant 1 : i32
    %0 = arith.muli %arg0, %c1_i32 : i32
    %1 = arith.addi %0, %arg1 : i32
    %c0_i32 = arith.constant 0 : i32
    %c0_i32_0 = arith.constant 0 : i32
    %c0_i32_1 = arith.constant 0 : i32
    return %1, %c0_i32, %c0_i32_0 : i32, i32, i32
  }
}

module attributes {stable_mosaic.version = 11 : i64} {
  func.func @_conv_phase_kernel(%arg0: i32, %arg1: i32, %arg2: memref<1x512x256xbf16, #tpu.memory_space<vmem>>, %arg3: memref<1x256x128xbf16, #tpu.memory_space<vmem>>, %arg4: memref<1x512x1xf32, #tpu.memory_space<vmem>>) attributes {dimension_semantics = [#tpu.dimension_semantics<parallel>, #tpu.dimension_semantics<parallel>], iteration_bounds = array<i64: 4, 1>, scalar_prefetch = 0 : i64, scratch_operands = 0 : i64, tpu.core_type = #tpu.core_type<tc>, window_params = [{transform_indices = @transform_0, window_bounds = array<i64: 1, 512, 256>}, {transform_indices = @transform_1, window_bounds = array<i64: 1, 256, 128>}, {transform_indices = @transform_2, window_bounds = array<i64: 1, 512, 1>}]} {
    %c0 = arith.constant 0 : index
    %c0_0 = arith.constant 0 : index
    %c0_1 = arith.constant 0 : index
    %0 = vector.load %arg2[%c0, %c0_0, %c0_1] : memref<1x512x256xbf16, #tpu.memory_space<vmem>>, vector<1x512x256xbf16>
    %1 = vector.shape_cast %0 : vector<1x512x256xbf16> to vector<512x256xbf16>
    %c0_2 = arith.constant 0 : index
    %c0_3 = arith.constant 0 : index
    %c0_4 = arith.constant 0 : index
    %2 = vector.load %arg3[%c0_2, %c0_3, %c0_4] : memref<1x256x128xbf16, #tpu.memory_space<vmem>>, vector<1x256x128xbf16>
    %3 = vector.shape_cast %2 : vector<1x256x128xbf16> to vector<256x128xbf16>
    %cst = arith.constant dense<0.000000e+00> : vector<512x128xf32>
    %4 = tpu.matmul %1, %3, %cst {dimension_numbers = #tpu.dot_dimension_numbers<[1], [0], [0], [1], [0, 0, 1, 1], [], []>} : vector<512x256xbf16>, vector<256x128xbf16>, vector<512x128xf32> -> vector<512x128xf32>
    %5 = vector.extract_strided_slice %4 {offsets = [0, 0], sizes = [512, 1], strides = [1, 1]} : vector<512x128xf32> to vector<512x1xf32>
    %6 = math.tanh %5 : vector<512x1xf32>
    %c0_5 = arith.constant 0 : index
    %c0_6 = arith.constant 0 : index
    %c0_7 = arith.constant 0 : index
    %7 = vector.load %arg4[%c0_5, %c0_6, %c0_7] : memref<1x512x1xf32, #tpu.memory_space<vmem>>, vector<1x512x1xf32>
    %8 = vector.shape_cast %7 : vector<1x512x1xf32> to vector<512x1xf32>
    %9 = vector.shape_cast %6 : vector<512x1xf32> to vector<1x512x1xf32>
    tpu.vector_store %arg4[%c0_5, %c0_6, %c0_7], %9 {strides = array<i32>} : memref<1x512x1xf32, #tpu.memory_space<vmem>>, vector<1x512x1xf32>,
    return
  }
  func.func @transform_0(%arg0: i32, %arg1: i32) -> (i32, i32, i32) {
    %c0_i32 = arith.constant 0 : i32
    %c0_i32_0 = arith.constant 0 : i32
    return %arg0, %arg1, %c0_i32 : i32, i32, i32
  }
  func.func @transform_1(%arg0: i32, %arg1: i32) -> (i32, i32, i32) {
    %c0_i32 = arith.constant 0 : i32
    %c0_i32_0 = arith.constant 0 : i32
    %c0_i32_1 = arith.constant 0 : i32
    return %arg0, %c0_i32, %c0_i32_0 : i32, i32, i32
  }
  func.func @transform_2(%arg0: i32, %arg1: i32) -> (i32, i32, i32) {
    %c0_i32 = arith.constant 0 : i32
    %c0_i32_0 = arith.constant 0 : i32
    return %arg0, %arg1, %c0_i32 : i32, i32, i32
  }
}

</mosaic_0001>

<bundles_post_ra>
// kernel: a_call__.4
= control target key start
LH: loop header
LB: loop body
LE: loop exit
PB: predicated region body
PF: predicated region fallthrough
CT: control target
= control target key end

     0   :  { %s766_s12 = smov 0   ;;  %s768_s13 = smov 0   ;;  %s837_s0 = inlined_call_operand.vmem [shape: f32[2,16], index: 0, kind: input, shape index: {}]   ;;  %s838_s1 = inlined_call_operand.vmem [shape: bf16[16,4096], index: 1, kind: input, shape index: {}]   ;;  %s839_s2 = inlined_call_operand.vmem [shape: bf16[2,4096], index: 2, kind: output, shape index: {0}]   ;;  %s840_s3 = inlined_call_operand.vmem [shape: f32[4,2,256], index: 3, kind: output, shape index: {1}]  }
   0x1   :  { %s770_s14 = smov 0  }
   0x2 LB: > { %s782_s15 = sadd.s32 4294967295, %s742_s14   ;;  %s785_s16 = sadd.s32 1, %s742_s14   ;;  %s742_s14 = sphi %s770_s14, %s844_s14   ;;  %s738_s13 = sphi %s768_s13, %s843_s13   ;;  %s734_s12 = sphi %s766_s12, %s842_s12  }
   0x3   : > { %s39_s17 = ssub.s32 %s742_s14, %s785_s16  ;;  %s42_s18 = sadd.s32 1, %s738_s13 }
   0x4   : > { %p40_p0 = scmp.eq.s32.totalorder %s39_s17, 0  ;;  %p49_p1 = scmp.ne.s32.totalorder %s738_s13, %s734_s12 }
   0x5   : > { %p50_p2 = scmp.eq.s32.totalorder %s742_s14, 0  ;;  %p664_p4 = scmp.ge.s32.totalorder %s742_s14, 4 }
   0x6   : > { %s794_s19 = scalar_select %p40_p0, %s738_s13, %s42_s18  }
   0x7   : > { %p51_p3 = por %p50_p2, %p49_p1  ;;  %130 = sbr.rel (%p664_p4) target bundleno = 22 (0x16), region = 20 }
   0xe   : > { %133 = sbr.rel (!%p51_p3) target bundleno = 22 (0x16), region = 24  ;;  %s135_s20 = sand.u32 (%p51_p3), 1, %s738_s13  }
   0xf   : > { %s692_s21 = sshll.u32 (%p51_p3), %s742_s14, 5  ;;  %s665_s22 = sshll.u32 (%p51_p3), %s135_s20, 6 }
  0x10   : > { %s140_s25 = scalar_lea.vmem (%p51_p3), %s838_s1, %s692_s21  ;;  %s137_s26 = scalar_lea.vmem (%p51_p3), [#allocation2], %s665_s22 }
  0x11   : > { %v153_v0 = vld [vmem:[%s140_s25] sm:$0xff] (%p51_p3)  ;;  %v155_v1 = vld [vmem:[%s140_s25 + $0x8] sm:$0xff] (%p51_p3)  ;;  %v157_v2 = vld [vmem:[%s140_s25 + $0x10] sm:$0xff] (%p51_p3) }
  0x12   : > { %154 = vst [vmem:[%s137_s26] sm:$0xff] (%p51_p3), %v153_v0  ;;  %156 = vst [vmem:[%s137_s26 + $0x8] sm:$0xff] (%p51_p3), %v155_v1  ;;  %v159_v3 = vld [vmem:[%s140_s25 + $0x18] sm:$0xff] (%p51_p3)  ;;  %v161_v4 = vld [vmem:[%s140_s25 + $0x80] sm:$0xff] (%p51_p3) }
  0x13   : > { %158 = vst [vmem:[%s137_s26 + $0x10] sm:$0xff] (%p51_p3), %v157_v2  ;;  %v163_v5 = vld [vmem:[%s140_s25 + $0x88] sm:$0xff] (%p51_p3)  ;;  %160 = vst [vmem:[%s137_s26 + $0x18] sm:$0xff] (%p51_p3), %v159_v3  ;;  %v165_v6 = vld [vmem:[%s140_s25 + $0x90] sm:$0xff] (%p51_p3) }
  0x14   : > { %162 = vst [vmem:[%s137_s26 + $0x20] sm:$0xff] (%p51_p3), %v161_v4  ;;  %164 = vst [vmem:[%s137_s26 + $0x28] sm:$0xff] (%p51_p3), %v163_v5  ;;  %v167_v7 = vld [vmem:[%s140_s25 + $0x98] sm:$0xff] (%p51_p3) }
  0x15   : > { %166 = vst [vmem:[%s137_s26 + $0x30] sm:$0xff] %v165_v6  ;;  %168 = vst [vmem:[%s137_s26 + $0x38] sm:$0xff] %v167_v7 }
  0x16 PF: > { %p668_p5 = scmp.ge.s32.totalorder %s742_s14, 1  ;;  %p173_p6 = scmp.lt.s32.totalorder %s742_s14, 5 }
  0x18   : > { %p174_p7 = pnand %p668_p5, %p173_p6 }
  0x19   : > { %s180_s27 = sand.u32 (!%p174_p7), 1, %s734_s12   ;;  %v744_v8 = vmov (!%p174_p7), 0   ;;  %v219_v9 = vld [vmem:[%s837_s0] sm:$0x3] (!%p174_p7)  ;;  %vm269_vm0 = vcmask (!%p174_p7), 130048   ;;  %v528_v29 = vlaneseq (!%p174_p7)  ;;  %s670_s5 = sshll.u32 (!%p174_p7), %s782_s15, 3 }
  0x1a   : > { %177 = sbr.rel (%p174_p7) target bundleno = 280 (0x118), region = 47  ;;  %s669_s28 = sshll.u32 (!%p174_p7), %s180_s27, 6  ;;  %305 = vmatprep.mubr.bf16.mxu0 (!%p174_p7), %v744_v8  ;;  %346 = vmatprep.mubr.bf16.mxu1 (!%p174_p7), %v744_v8  ;;  %v220_v23 = vpack.c.bf16 (!%p174_p7), %v219_v9, %v219_v9  ;;  %v745_v27 = vmov (!%p174_p7), 1966171168   ;;  %vm461_vm1 = vcmask (!%p174_p7), 1041408   ;;  %vm490_vm2 = vcmask (!%p174_p7), 1040384  }
  0x1b   : > { %s182_s4 = scalar_lea.vmem (!%p174_p7), [#allocation2], %s669_s28  ;;  %v526_v28 = vunpack.c.l.s4 (!%p174_p7), %v745_v27  ;;  %v529_v31 = vshrl.u32 (!%p174_p7), %v528_v29, 7  ;;  %p809_p8 = scmp.lt.s32.totalorder (!%p174_p7), %s670_s5, 31 }
  0x1c   : > { %v221_v10 = vld [vmem:[%s182_s4] sm:$0xff] (!%p174_p7)  ;;  %v222_v12 = vld [vmem:[%s182_s4 + $0x8] sm:$0xff] (!%p174_p7)  ;;  %v223_v16 = vld [vmem:[%s182_s4 + $0x10] sm:$0xff] (!%p174_p7)  ;;  %p213_p9 = scmp.lt.s32.totalorder (!%p174_p7), %s782_s15, 3 }
  0x1d   : > { %v225_v11 = vld [vmem:[%s182_s4 + $0x20] sm:$0xff] (!%p174_p7)  ;;  %v226_v14 = vld [vmem:[%s182_s4 + $0x28] sm:$0xff] (!%p174_p7)  ;;  %v227_v17 = vld [vmem:[%s182_s4 + $0x30] sm:$0xff] (!%p174_p7)  ;;  %v527_v30 = vunpack.c.0.s8 (!%p174_p7), %v526_v28 }
  0x1e   : > { %v674_v13 = vcombine.high (!%p174_p7), %v221_v10, %v225_v11  ;;  %v673_v15 = vcombine.low (!%p174_p7), %v221_v10, %v225_v11  ;;  %v676_v18 = vcombine.high (!%p174_p7), %v222_v12, %v226_v14  ;;  %v675_v19 = vcombine.low (!%p174_p7), %v222_v12, %v226_v14  ;;  %v224_v21 = vld [vmem:[%s182_s4 + $0x18] sm:$0xff] (!%p174_p7) }
  0x1f   : > { %v678_v20 = vcombine.high (!%p174_p7), %v223_v16, %v227_v17  ;;  %v228_v22 = vld [vmem:[%s182_s4 + $0x38] sm:$0xff] (!%p174_p7)  ;;  %v677_v25 = vcombine.low (!%p174_p7), %v223_v16, %v227_v17  ;;  %v530_v33 = vsub.s32 (!%p174_p7), %v527_v30, %v529_v31 }
  0x20   : > { %273 = vmatprep.subr.bf16.mxu0 (!%p174_p7), %v674_v13  ;;  %v680_v24 = vcombine.high (!%p174_p7), %v224_v21, %v228_v22  ;;  %314 = vmatprep.subr.bf16.mxu1 (!%p174_p7), %v676_v18  ;;  %v679_v26 = vcombine.low (!%p174_p7), %v224_v21, %v228_v22 }
  0x21   : > { %274 = vmatpush1.bf16.msra.mxu0 %v673_v15  ;;  %315 = vmatpush1.bf16.msra.mxu1 %v675_v19  ;;  %s846_s5 = smov (!%p809_p8, %s670_s5), 31  ;;  %s848_s15 = smov (!%p213_p9, %s782_s15), 3 }
  0x22   : > { %355 = vmatprep.subr.bf16.mxu0 %v678_v20  ;;  %396 = vmatprep.subr.bf16.mxu1 %v680_v24  ;;  %s211_s9 = scalar_lea.vmem %s839_s2, %s846_s5  ;;  %s693_s10 = sshll.u32 %s848_s15, 2 }
  0x23   : > { %s217_s14 = scalar_lea.vmem %s840_s3, %s693_s10 }
  0x24   : > { %681 = vmatmul.mubr.msk.bf16.vlgmr.msra.gmra.mrb[0].mxu0 %vm269_vm0, %v220_v23  ;;  %682 = vmatmul.mubr.msk.bf16.vlgmr.msra.gmra.mrb[0].mxu1 %vm269_vm0, %v220_v23 }
  0x25   : > { %356 = vmatpush1.bf16.msra.mxu0 %v677_v25  ;;  %397 = vmatpush1.bf16.msra.mxu1 %v679_v26 }
  0x26   : > { %387 = vmatprep.mubr.bf16.mxu0 %v744_v8  ;;  %428 = vmatprep.mubr.bf16.mxu1 %v744_v8 }
  0x2c   : > { %683 = vmatmul.mubr.msk.bf16.vlgmr.msra.gmra.mrb[4].mxu0 %vm269_vm0, %v220_v23  ;;  %684 = vmatmul.mubr.msk.bf16.vlgmr.msra.gmra.mrb[4].mxu1 %vm269_vm0, %v220_v23 }
  0xf7   : > { %v307_v32 = vpop.f32.mrb[0].mxu0  ;;  %v348_v35 = vpop.f32.mrb[0].mxu1 }
  0xf8   : > { %v439_v34 = vmul.f32 %v307_v32, %v307_v32  ;;  %v309_v36 = vpop.f32.mrb[1].mxu0  ;;  %v443_v37 = vadd.f32 %v348_v35, %v307_v32  ;;  %v445_v38 = vmul.f32 %v348_v35, %v348_v35  ;;  %v350_v41 = vpop.f32.mrb[1].mxu1 }
  0xf9   : > { %v440_v39 = vmul.f32 %v309_v36, %v309_v36  ;;  %v686_v40 = vpack.c.bf16 %v309_v36, %v307_v32  ;;  %v311_v42 = vpop.f32.mrb[2].mxu0  ;;  %v444_v43 = vadd.f32 %v350_v41, %v309_v36  ;;  %v446_v44 = vmul.f32 %v350_v41, %v350_v41  ;;  %v352_v46 = vpop.f32.mrb[2].mxu1 }
  0xfa   : > { %v687_v45 = vpack.c.bf16 %v350_v41, %v348_v35  ;;  %v312_v47 = vpop.f32.mrb[3].mxu0  ;;  %v447_v48 = vadd.f32 %v445_v38, %v439_v34  ;;  %v353_v50 = vpop.f32.mrb[3].mxu1 }
  0xfb   : > { %v531_v49 = vrot.slane %v686_v40, %v530_v33  ;;  %v448_v51 = vadd.f32 %v446_v44, %v440_v39 }
  0xfc   : > { %v538_v52 = vrot.slane %v687_v45, %v530_v33 }
  0xfe   : > { %v553_v53 = vcombine.low %v531_v49, %v538_v52 }
  0xff   : > { %v389_v54 = vpop.f32.mrb[4].mxu0  ;;  %v430_v57 = vpop.f32.mrb[4].mxu1 }
 0x100   : > { %v449_v55 = vadd.f32 %v443_v37, %v389_v54  ;;  %v451_v56 = vmul.f32 %v389_v54, %v389_v54  ;;  %v391_v58 = vpop.f32.mrb[5].mxu0  ;;  %v457_v59 = vmul.f32 %v430_v57, %v430_v57  ;;  %v432_v63 = vpop.f32.mrb[5].mxu1  ;;  %v561_v23 = vrot.slane %v553_v53, %v530_v33 }
 0x101   : > { %v450_v60 = vadd.f32 %v444_v43, %v391_v58  ;;  %v452_v61 = vmul.f32 %v391_v58, %v391_v58  ;;  %v688_v62 = vpack.c.bf16 %v391_v58, %v389_v54  ;;  %v393_v0 = vpop.f32.mrb[6].mxu0  ;;  %v458_v3 = vmul.f32 %v432_v63, %v432_v63  ;;  %v434_v5 = vpop.f32.mrb[6].mxu1 }
 0x102   : > { %v453_v1 = vadd.f32 %v451_v56, %v447_v48  ;;  %v455_v2 = vadd.f32 %v449_v55, %v430_v57  ;;  %v689_v4 = vpack.c.bf16 %v432_v63, %v430_v57  ;;  %v394_v6 = vpop.f32.mrb[7].mxu0  ;;  %v435_v10 = vpop.f32.mrb[7].mxu1 }
 0x103   : > { %v454_v7 = vadd.f32 %v452_v61, %v448_v51  ;;  %v545_v8 = vrot.slane %v688_v62, %v530_v33  ;;  %v456_v9 = vadd.f32 %v450_v60, %v432_v63 }
 0x104   : > { %v459_v11 = vadd.f32 %v457_v59, %v453_v1  ;;  %v462_v12 = vsel %vm461_vm1, %v455_v2, 0.0  ;;  %v552_v13 = vrot.slane %v689_v4, %v530_v33 }
 0x105   : > { %v463_v14 = vrot.slane %v462_v12, 4  ;;  %v460_v15 = vadd.f32 %v458_v3, %v454_v7  ;;  %v469_v16 = vsel %vm461_vm1, %v456_v9, 0.0 }
 0x106   : > { %v476_v17 = vsel %vm461_vm1, %v459_v11, 0.0  ;;  %v470_v18 = vrot.slane %v469_v16, 4  ;;  %v554_v19 = vcombine.low %v545_v8, %v552_v13 }
 0x107   : > { %v464_v20 = vadd.f32 %v463_v14, %v462_v12  ;;  %v477_v21 = vrot.slane %v476_v17, 4  ;;  %v483_v22 = vsel %vm461_vm1, %v460_v15, 0.0 }
 0x108   : > { %v471_v24 = vadd.f32 %v470_v18, %v469_v16  ;;  %v484_v25 = vrot.slane %v483_v22, 4  ;;  %v568_v26 = vrot.slane %v554_v19, %v530_v33 }
 0x109   : > { %v465_v27 = vrot.slane %v464_v20, 2  ;;  %v478_v28 = vadd.f32 %v477_v21, %v476_v17 }
 0x10a   : > { %v472_v29 = vrot.slane %v471_v24, 2  ;;  %v485_v30 = vadd.f32 %v484_v25, %v483_v22  ;;  %v569_v31 = vcombine.low %v561_v23, %v568_v26 }
 0x10b   : > { %v466_v32 = vadd.f32 %v465_v27, %v464_v20  ;;  %v479_v34 = vrot.slane %v478_v28, 2 }
 0x10c   : > { %v473_v35 = vadd.f32 %v472_v29, %v471_v24  ;;  %v486_v36 = vrot.slane %v485_v30, 2  ;;  %571 = vst [vmem:[%s211_s9] sm:$0xff] %v569_v31 }
 0x10d   : > { %v467_v37 = vrot.slane %v466_v32, 1  ;;  %v480_v38 = vadd.f32 %v479_v34, %v478_v28 }
 0x10e   : > { %v474_v39 = vrot.slane %v473_v35, 1  ;;  %v487_v33 = vadd.f32 %v486_v36, %v485_v30 }
 0x10f   : > { %v481_v40 = vrot.slane %v480_v38, 1  ;;  %v468_v42 = vadd.f32 %v467_v37, %v466_v32 }
 0x110   : > { %v488_v41 = vrot.slane %v487_v33, 1  ;;  %v475_v44 = vadd.f32 %v474_v39, %v473_v35 }
 0x111   : > { %v482_v43 = vadd.f32 %v481_v40, %v480_v38 }
 0x112   : > { %v489_v45 = vadd.f32 %v488_v41, %v487_v33 }
 0x113   : > { %v491_v46 = vsel %vm490_vm2, %v468_v42, %v482_v43 }
 0x114   : > { %v492_v47 = vsel %vm490_vm2, %v475_v44, %v489_v45 }
 0x115   : > { %v495_v48 = vcombine.low %v491_v46, %v492_v47 }
 0x117   : > { %685 = vst.sshfl [vmem:[%s217_s14] sm:$0x33 pattern:$0x76325410] %v495_v48 }
 0x118 PF: > { %p11_p10 = scmp.ge.s32.totalorder %s785_s16, 6   ;;  %s842_s12 = smov %s738_s13 }
 0x119   : > { %s843_s13 = smov %s794_s19  ;;  %s844_s14 = smov %s785_s16 }
 0x11a   :  { %13 = sbr.rel (!%p11_p10) target bundleno = 2 (0x2), region = 98 }

// kernel: a_call__.5
= control target key start
LH: loop header
LB: loop body
LE: loop exit
PB: predicated region body
PF: predicated region fallthrough
CT: control target
= control target key end

     0   :  { %s1595_s12 = smov 0   ;;  %s1597_s13 = smov 0   ;;  %s1724_s0 = inlined_call_operand.vmem [shape: bf16[4,32,1024], index: 0, kind: input, shape index: {}]   ;;  %s1725_s1 = inlined_call_operand.vmem [shape: bf16[4,1024,128], index: 1, kind: input, shape index: {}]   ;;  %s1726_s2 = inlined_call_operand.vmem [shape: bf16[4,32,128], index: 2, kind: output, shape index: {0}]   ;;  %s1727_s3 = inlined_call_operand.vmem [shape: f32[4,2,128], index: 3, kind: output, shape index: {1}]  }
   0x1   :  { %s1599_s14 = smov 0  }
   0x2 LB: > { %s26_s15 = sadd.s32 1, %s1569_s13  ;;  %p1239_p0 = scmp.ge.s32.totalorder %s1573_s14, 1  ;;  %s1573_s14 = sphi %s1599_s14, %s14_s14   ;;  %s1569_s13 = sphi %s1597_s13, %s1729_s13   ;;  %s1565_s12 = sphi %s1595_s12, %s1728_s12  }
   0x3   : > { %p28_p1 = scmp.ge.s32.totalorder %s26_s15, 4  ;;  %p174_p2 = scmp.lt.s32.totalorder %s1573_s14, 5 }
   0x5   : > { %s1731_s15 = smov (%p28_p1, %s26_s15), 0  ;;  %p175_p3 = pnand %p1239_p0, %p174_p2 }
   0x6   : > { %p218_p4 = scmp.lt.s32.totalorder (!%p175_p3), %s1565_s12, 3  ;;  %vm1076_vm0 = vcmask (!%p175_p3), 1040384  }
   0x7   : > { %178 = sbr.rel (%p175_p3) target bundleno = 330 (0x14a), region = 28 }
   0xe   : > { %s1733_s12 = smov (!%p218_p4, %s1565_s12), 3 }
   0xf   : > { %s1334_s16 = sshll.u32 %s1733_s12, 9  ;;  %s1333_s20 = sshll.u32 %s1733_s12, 7 }
  0x10   : > { %s1619_s19 = scalar_lea.vmem %s1725_s1, %s1334_s16  ;;  %s1655_s23 = scalar_lea.vmem %s1724_s0, %s1333_s20 }
  0x11   : > { %v1487_v0 = vld [vmem:[%s1619_s19 + $0x40] sm:$0xff]   ;;  %v1491_v4 = vld [vmem:[%s1619_s19 + $0x48] sm:$0xff]   ;;  %v1495_v8 = vld [vmem:[%s1619_s19 + $0x50] sm:$0xff]   ;;  %s1335_s24 = sshll.u32 %s1733_s12, 4  ;;  %s1246_s28 = sshll.u32 %s1733_s12, 1 }
  0x12   : > { %v1488_v1 = vld [vmem:[%s1619_s19 + $0xc0] sm:$0xff]   ;;  %1351 = vmatprep.subr.bf16.mxu0 %v1487_v0  ;;  %v1492_v5 = vld [vmem:[%s1619_s19 + $0xc8] sm:$0xff]   ;;  %v1496_v9 = vld [vmem:[%s1619_s19 + $0xd0] sm:$0xff]   ;;  %s241_s27 = scalar_lea.vmem %s1726_s2, %s1335_s24  ;;  %s247_s4 = scalar_lea.vmem %s1727_s3, %s1246_s28 }
  0x13   : > { %v1489_v2 = vld [vmem:[%s1619_s19] sm:$0xff]   ;;  %1379 = vmatprep.subr.bf16.mxu1 %v1488_v1  ;;  %v1493_v6 = vld [vmem:[%s1619_s19 + $0x8] sm:$0xff]   ;;  %v1497_v10 = vld [vmem:[%s1619_s19 + $0x10] sm:$0xff]  }
  0x14   : > { %v1490_v3 = vld [vmem:[%s1619_s19 + $0x80] sm:$0xff]   ;;  %1352 = vmatpush3.bf16.msra.mxu0 %v1489_v2  ;;  %v1494_v7 = vld [vmem:[%s1619_s19 + $0x88] sm:$0xff]   ;;  %v1498_v11 = vld [vmem:[%s1619_s19 + $0x90] sm:$0xff]  }
  0x15   : > { %1380 = vmatpush3.bf16.msra.mxu1 %v1490_v3  ;;  %1353 = vmatprep.subr.bf16.mxu0 %v1491_v4  ;;  %v1499_v12 = vld [vmem:[%s1619_s19 + $0x58] sm:$0xff]   ;;  %v1503_v16 = vld [vmem:[%s1619_s19 + $0x60] sm:$0xff]   ;;  %v1507_v20 = vld [vmem:[%s1619_s19 + $0x68] sm:$0xff]  }
  0x16   : > { %1381 = vmatprep.subr.bf16.mxu1 %v1492_v5  ;;  %v1500_v13 = vld [vmem:[%s1619_s19 + $0xd8] sm:$0xff]   ;;  %v1504_v17 = vld [vmem:[%s1619_s19 + $0xe0] sm:$0xff]   ;;  %v1508_v21 = vld [vmem:[%s1619_s19 + $0xe8] sm:$0xff]  }
  0x17   : > { %v1501_v14 = vld [vmem:[%s1619_s19 + $0x18] sm:$0xff]   ;;  %v1505_v18 = vld [vmem:[%s1619_s19 + $0x20] sm:$0xff]   ;;  %v1509_v22 = vld [vmem:[%s1619_s19 + $0x28] sm:$0xff]  }
  0x18   : > { %1354 = vmatpush3.bf16.msra.mxu0 %v1493_v6  ;;  %v1502_v15 = vld [vmem:[%s1619_s19 + $0x98] sm:$0xff]   ;;  %v1506_v19 = vld [vmem:[%s1619_s19 + $0xa0] sm:$0xff]   ;;  %v1510_v23 = vld [vmem:[%s1619_s19 + $0xa8] sm:$0xff]  }
  0x19   : > { %1382 = vmatpush3.bf16.msra.mxu1 %v1494_v7  ;;  %1355 = vmatprep.subr.bf16.mxu0 %v1495_v8  ;;  %v1511_v24 = vld [vmem:[%s1619_s19 + $0x70] sm:$0xff]   ;;  %v1515_v28 = vld [vmem:[%s1619_s19 + $0x78] sm:$0xff]   ;;  %v250_v32 = vld [vmem:[%s1655_s23] sm:$0xff] }
  0x1a   : > { %1383 = vmatprep.subr.bf16.mxu1 %v1496_v9  ;;  %v1512_v25 = vld [vmem:[%s1619_s19 + $0xf0] sm:$0xff]   ;;  %v1516_v29 = vld [vmem:[%s1619_s19 + $0xf8] sm:$0xff]   ;;  %v254_v33 = vld [vmem:[%s1655_s23 + $0x20] sm:$0xff] }
  0x1b   : > { %v1513_v26 = vld [vmem:[%s1619_s19 + $0x30] sm:$0xff]   ;;  %v1517_v30 = vld [vmem:[%s1619_s19 + $0x38] sm:$0xff]   ;;  %v251_v34 = vld [vmem:[%s1655_s23 + $0x8] sm:$0xff]  ;;  %v1247_v35 = vcombine.low %v250_v32, %v254_v33  ;;  %v1248_v36 = vcombine.high %v250_v32, %v254_v33 }
  0x1c   : > { %1356 = vmatpush3.bf16.msra.mxu0 %v1497_v10  ;;  %v1514_v27 = vld [vmem:[%s1619_s19 + $0xb0] sm:$0xff]   ;;  %v1518_v31 = vld [vmem:[%s1619_s19 + $0xb8] sm:$0xff]   ;;  %v255_v37 = vld [vmem:[%s1655_s23 + $0x28] sm:$0xff] }
  0x1d   : > { %1384 = vmatpush3.bf16.msra.mxu1 %v1498_v11  ;;  %1357 = vmatprep.subr.bf16.mxu0 %v1499_v12  ;;  %v1249_v38 = vcombine.low %v251_v34, %v255_v37  ;;  %v1250_v39 = vcombine.high %v251_v34, %v255_v37  ;;  %v1519_v40 = vld [vmem:[%s1619_s19 + $0x140] sm:$0xff]   ;;  %v1523_v44 = vld [vmem:[%s1619_s19 + $0x148] sm:$0xff]   ;;  %v1527_v48 = vld [vmem:[%s1619_s19 + $0x150] sm:$0xff]  }
  0x1e   : > { %1385 = vmatprep.subr.bf16.mxu1 %v1500_v13  ;;  %890 = vmatprep.mubr.bf16.mxu0 %v1248_v36  ;;  %v1520_v41 = vld [vmem:[%s1619_s19 + $0x1c0] sm:$0xff]   ;;  %v1524_v45 = vld [vmem:[%s1619_s19 + $0x1c8] sm:$0xff]   ;;  %v1528_v49 = vld [vmem:[%s1619_s19 + $0x1d0] sm:$0xff]  }
  0x1f   : > { %939 = vmatprep.mubr.bf16.mxu1 %v1250_v39  ;;  %v1521_v42 = vld [vmem:[%s1619_s19 + $0x100] sm:$0xff]   ;;  %v1525_v46 = vld [vmem:[%s1619_s19 + $0x108] sm:$0xff]   ;;  %v1529_v50 = vld [vmem:[%s1619_s19 + $0x110] sm:$0xff]  }
  0x20   : > { %1358 = vmatpush3.bf16.msra.mxu0 %v1501_v14  ;;  %v1522_v43 = vld [vmem:[%s1619_s19 + $0x180] sm:$0xff]   ;;  %v1526_v47 = vld [vmem:[%s1619_s19 + $0x188] sm:$0xff]   ;;  %v1530_v51 = vld [vmem:[%s1619_s19 + $0x190] sm:$0xff]  }
  0x21   : > { %1386 = vmatpush3.bf16.msra.mxu1 %v1502_v15  ;;  %1359 = vmatprep.subr.bf16.mxu0 %v1503_v16  ;;  %v1531_v52 = vld [vmem:[%s1619_s19 + $0x158] sm:$0xff]   ;;  %v1535_v56 = vld [vmem:[%s1619_s19 + $0x160] sm:$0xff]   ;;  %v259_v63 = vld [vmem:[%s1655_s23 + $0x48] sm:$0xff] }
  0x22   : > { %1387 = vmatprep.subr.bf16.mxu1 %v1504_v17  ;;  %v1532_v53 = vld [vmem:[%s1619_s19 + $0x1d8] sm:$0xff]   ;;  %v1536_v57 = vld [vmem:[%s1619_s19 + $0x1e0] sm:$0xff]   ;;  %v263_v0 = vld [vmem:[%s1655_s23 + $0x68] sm:$0xff] }
  0x23   : > { %v1533_v54 = vld [vmem:[%s1619_s19 + $0x118] sm:$0xff]   ;;  %v1537_v58 = vld [vmem:[%s1619_s19 + $0x120] sm:$0xff]   ;;  %v1258_v2 = vcombine.high %v259_v63, %v263_v0  ;;  %v1539_v3 = vld [vmem:[%s1619_s19 + $0x168] sm:$0xff]   ;;  %v1257_v4 = vcombine.low %v259_v63, %v263_v0 }
  0x24   : > { %1360 = vmatpush3.bf16.msra.mxu0 %v1505_v18  ;;  %v1534_v55 = vld [vmem:[%s1619_s19 + $0x198] sm:$0xff]   ;;  %v1538_v59 = vld [vmem:[%s1619_s19 + $0x1a0] sm:$0xff]   ;;  %v1540_v5 = vld [vmem:[%s1619_s19 + $0x1e8] sm:$0xff]  }
  0x25   : > { %1388 = vmatpush3.bf16.msra.mxu1 %v1506_v19  ;;  %1361 = vmatprep.subr.bf16.mxu0 %v1507_v20  ;;  %v258_v60 = vld [vmem:[%s1655_s23 + $0x40] sm:$0xff]  ;;  %v1541_v6 = vld [vmem:[%s1619_s19 + $0x128] sm:$0xff]   ;;  %v1543_v8 = vld [vmem:[%s1619_s19 + $0x170] sm:$0xff]  }
  0x26   : > { %1389 = vmatprep.subr.bf16.mxu1 %v1508_v21  ;;  %v262_v61 = vld [vmem:[%s1655_s23 + $0x60] sm:$0xff]  ;;  %v1542_v7 = vld [vmem:[%s1619_s19 + $0x1a8] sm:$0xff]   ;;  %v1544_v9 = vld [vmem:[%s1619_s19 + $0x1f0] sm:$0xff]  }
  0x27   : > { %v1256_v62 = vcombine.high %v258_v60, %v262_v61  ;;  %v1255_v1 = vcombine.low %v258_v60, %v262_v61  ;;  %v1545_v10 = vld [vmem:[%s1619_s19 + $0x130] sm:$0xff]   ;;  %v1547_v12 = vld [vmem:[%s1619_s19 + $0x178] sm:$0xff]  }
  0x28   : > { %1362 = vmatpush3.bf16.msra.mxu0 %v1509_v22  ;;  %v1546_v11 = vld [vmem:[%s1619_s19 + $0x1b0] sm:$0xff]   ;;  %v1548_v13 = vld [vmem:[%s1619_s19 + $0x1f8] sm:$0xff]  }
  0x29   : > { %1390 = vmatpush3.bf16.msra.mxu1 %v1510_v23  ;;  %1363 = vmatprep.subr.bf16.mxu0 %v1511_v24  ;;  %v1549_v14 = vld [vmem:[%s1619_s19 + $0x138] sm:$0xff]   ;;  %v252_v16 = vld [vmem:[%s1655_s23 + $0x10] sm:$0xff] }
  0x2a   : > { %1391 = vmatprep.subr.bf16.mxu1 %v1512_v25  ;;  %v1550_v15 = vld [vmem:[%s1619_s19 + $0x1b8] sm:$0xff]   ;;  %v256_v17 = vld [vmem:[%s1655_s23 + $0x30] sm:$0xff] }
  0x2b   : > { %v253_v18 = vld [vmem:[%s1655_s23 + $0x18] sm:$0xff]  ;;  %v1251_v20 = vcombine.low %v252_v16, %v256_v17  ;;  %v1252_v21 = vcombine.high %v252_v16, %v256_v17  ;;  %v260_v24 = vld [vmem:[%s1655_s23 + $0x50] sm:$0xff] }
  0x2c   : > { %1364 = vmatpush3.bf16.msra.mxu0 %v1513_v26  ;;  %v257_v19 = vld [vmem:[%s1655_s23 + $0x38] sm:$0xff]  ;;  %v264_v25 = vld [vmem:[%s1655_s23 + $0x70] sm:$0xff] }
  0x2d   : > { %1392 = vmatpush3.bf16.msra.mxu1 %v1514_v27  ;;  %1365 = vmatprep.subr.bf16.mxu0 %v1515_v28  ;;  %v1253_v22 = vcombine.low %v253_v18, %v257_v19  ;;  %v1254_v23 = vcombine.high %v253_v18, %v257_v19  ;;  %v261_v26 = vld [vmem:[%s1655_s23 + $0x58] sm:$0xff]  ;;  %v1260_v27 = vcombine.high %v260_v24, %v264_v25 }
  0x2e   : > { %1393 = vmatprep.subr.bf16.mxu1 %v1516_v29  ;;  %v265_v28 = vld [vmem:[%s1655_s23 + $0x78] sm:$0xff] }
  0x2f   : > { %v1262_v29 = vcombine.high %v261_v26, %v265_v28 }
  0x30   : > { %1366 = vmatpush3.bf16.msra.mxu0 %v1517_v30  ;;  %v1259_v30 = vcombine.low %v260_v24, %v264_v25 }
  0x31   : > { %1394 = vmatpush3.bf16.msra.mxu1 %v1518_v31  ;;  %1407 = vmatprep.subr.bf16.mxu0 %v1519_v40  ;;  %v1261_v31 = vcombine.low %v261_v26, %v265_v28 }
  0x32   : > { %1435 = vmatprep.subr.bf16.mxu1 %v1520_v41 }
  0x33   : > { %891 = vmatmul.mubr.bf16.vlgmr.msra.gmra.mrb[0].mxu0 %v1247_v35 }
  0x34   : > { %940 = vmatmul.mubr.bf16.vlgmr.msra.gmra.mrb[0].mxu1 %v1249_v38  ;;  %1408 = vmatpush3.bf16.msra.mxu0 %v1521_v42 }
  0x35   : > { %1436 = vmatpush3.bf16.msra.mxu1 %v1522_v43  ;;  %1409 = vmatprep.subr.bf16.mxu0 %v1523_v44 }
  0x36   : > { %1437 = vmatprep.subr.bf16.mxu1 %v1524_v45  ;;  %898 = vmatprep.mubr.bf16.mxu0 %v1256_v62 }
  0x37   : > { %947 = vmatprep.mubr.bf16.mxu1 %v1258_v2 }
  0x38   : > { %1410 = vmatpush3.bf16.msra.mxu0 %v1525_v46 }
  0x39   : > { %1438 = vmatpush3.bf16.msra.mxu1 %v1526_v47  ;;  %1411 = vmatprep.subr.bf16.mxu0 %v1527_v48 }
  0x3a   : > { %1439 = vmatprep.subr.bf16.mxu1 %v1528_v49 }
  0x3b   : > { %899 = vmatmul.mubr.bf16.gmra.mrb[4].mxu0 %v1255_v1 }
  0x3c   : > { %1412 = vmatpush3.bf16.msra.mxu0 %v1529_v50  ;;  %948 = vmatmul.mubr.bf16.gmra.mrb[4].mxu1 %v1257_v4 }
  0x3d   : > { %1440 = vmatpush3.bf16.msra.mxu1 %v1530_v51  ;;  %1413 = vmatprep.subr.bf16.mxu0 %v1531_v52 }
  0x3e   : > { %1441 = vmatprep.subr.bf16.mxu1 %v1532_v53  ;;  %988 = vmatprep.mubr.bf16.mxu0 %v1252_v21 }
  0x3f   : > { %1037 = vmatprep.mubr.bf16.mxu1 %v1254_v23 }
  0x40   : > { %1414 = vmatpush3.bf16.msra.mxu0 %v1533_v54 }
  0x41   : > { %1442 = vmatpush3.bf16.msra.mxu1 %v1534_v55  ;;  %1415 = vmatprep.subr.bf16.mxu0 %v1535_v56 }
  0x42   : > { %1443 = vmatprep.subr.bf16.mxu1 %v1536_v57 }
  0x44   : > { %1416 = vmatpush3.bf16.msra.mxu0 %v1537_v58 }
  0x45   : > { %1444 = vmatpush3.bf16.msra.mxu1 %v1538_v59  ;;  %1417 = vmatprep.subr.bf16.mxu0 %v1539_v3 }
  0x46   : > { %1445 = vmatprep.subr.bf16.mxu1 %v1540_v5 }
  0x48   : > { %1418 = vmatpush3.bf16.msra.mxu0 %v1541_v6 }
  0x49   : > { %1446 = vmatpush3.bf16.msra.mxu1 %v1542_v7  ;;  %1419 = vmatprep.subr.bf16.mxu0 %v1543_v8 }
  0x4a   : > { %1447 = vmatprep.subr.bf16.mxu1 %v1544_v9 }
  0x4c   : > { %1420 = vmatpush3.bf16.msra.mxu0 %v1545_v10 }
  0x4d   : > { %1448 = vmatpush3.bf16.msra.mxu1 %v1546_v11  ;;  %1421 = vmatprep.subr.bf16.mxu0 %v1547_v12 }
  0x4e   : > { %1449 = vmatprep.subr.bf16.mxu1 %v1548_v13 }
  0x50   : > { %1422 = vmatpush3.bf16.msra.mxu0 %v1549_v14 }
  0x51   : > { %1450 = vmatpush3.bf16.msra.mxu1 %v1550_v15 }
  0x53   : > { %989 = vmatmul.mubr.bf16.vlgmr.msra.gmra.mrb[8].mxu0 %v1251_v20 }
  0x54   : > { %1038 = vmatmul.mubr.bf16.vlgmr.msra.gmra.mrb[8].mxu1 %v1253_v22  ;;  %996 = vmatprep.mubr.bf16.mxu0 %v1260_v27 }
  0x55   : > { %1045 = vmatprep.mubr.bf16.mxu1 %v1262_v29 }
  0x5b   : > { %997 = vmatmul.mubr.bf16.gmra.mrb[12].mxu0 %v1259_v30 }
  0x5c   : > { %1046 = vmatmul.mubr.bf16.gmra.mrb[12].mxu1 %v1261_v31 }
 0x106   : > { %v1367_v32 = vpop.f32.mrb[0].mxu0 }
 0x107   : > { %v1395_v33 = vpop.f32.mrb[0].mxu1  ;;  %v1368_v34 = vpop.f32.mrb[1].mxu0 }
 0x108   : > { %v1369_v35 = vadd.f32 %v1368_v34, %v1367_v32  ;;  %v1396_v36 = vpop.f32.mrb[1].mxu1  ;;  %v1370_v37 = vpop.f32.mrb[2].mxu0 }
 0x109   : > { %v1397_v38 = vadd.f32 %v1396_v36, %v1395_v33  ;;  %v1398_v39 = vpop.f32.mrb[2].mxu1  ;;  %v1371_v40 = vpop.f32.mrb[3].mxu0 }
 0x10a   : > { %v1372_v41 = vadd.f32 %v1371_v40, %v1370_v37  ;;  %v1399_v42 = vpop.f32.mrb[3].mxu1 }
 0x10b   : > { %v942_v43 = vadd.f32 %v1397_v38, %v1369_v35  ;;  %v1400_v44 = vadd.f32 %v1399_v42, %v1398_v39 }
 0x10d   : > { %v945_v45 = vadd.f32 %v1400_v44, %v1372_v41 }
 0x10e   : > { %v1373_v46 = vpop.f32.mrb[4].mxu0 }
 0x10f   : > { %v1401_v47 = vpop.f32.mrb[4].mxu1  ;;  %v1374_v48 = vpop.f32.mrb[5].mxu0 }
 0x110   : > { %v1375_v49 = vadd.f32 %v1374_v48, %v1373_v46  ;;  %v1402_v50 = vpop.f32.mrb[5].mxu1  ;;  %v1376_v51 = vpop.f32.mrb[6].mxu0 }
 0x111   : > { %v1403_v52 = vadd.f32 %v1402_v50, %v1401_v47  ;;  %v1404_v53 = vpop.f32.mrb[6].mxu1  ;;  %v1377_v54 = vpop.f32.mrb[7].mxu0 }
 0x112   : > { %v1378_v55 = vadd.f32 %v1377_v54, %v1376_v51  ;;  %v1405_v56 = vpop.f32.mrb[7].mxu1 }
 0x113   : > { %v950_v57 = vadd.f32 %v1403_v52, %v1375_v49  ;;  %v1406_v58 = vadd.f32 %v1405_v56, %v1404_v53 }
 0x115   : > { %v953_v59 = vadd.f32 %v1406_v58, %v1378_v55 }
 0x126   : > { %v1423_v60 = vpop.f32.mrb[8].mxu0 }
 0x127   : > { %v1451_v61 = vpop.f32.mrb[8].mxu1  ;;  %v1424_v62 = vpop.f32.mrb[9].mxu0 }
 0x128   : > { %v1452_v63 = vpop.f32.mrb[9].mxu1  ;;  %v1425_v0 = vadd.f32 %v1424_v62, %v1423_v60  ;;  %v1426_v2 = vpop.f32.mrb[10].mxu0 }
 0x129   : > { %v1453_v1 = vadd.f32 %v1452_v63, %v1451_v61  ;;  %v1454_v3 = vpop.f32.mrb[10].mxu1  ;;  %v1427_v4 = vpop.f32.mrb[11].mxu0 }
 0x12a   : > { %v1455_v5 = vpop.f32.mrb[11].mxu1  ;;  %v991_v6 = vadd.f32 %v1425_v0, %v942_v43  ;;  %v1428_v7 = vadd.f32 %v1427_v4, %v1426_v2 }
 0x12b   : > { %v1456_v8 = vadd.f32 %v1455_v5, %v1454_v3 }
 0x12c   : > { %v1040_v9 = vadd.f32 %v1453_v1, %v991_v6  ;;  %v994_v10 = vadd.f32 %v1428_v7, %v945_v45 }
 0x12e   : > { %v1043_v11 = vadd.f32 %v1456_v8, %v994_v10  ;;  %v1429_v12 = vpop.f32.mrb[12].mxu0  ;;  %v1063_v14 = vmul.f32 %v1040_v9, %v1040_v9 }
 0x12f   : > { %v1457_v13 = vpop.f32.mrb[12].mxu1  ;;  %v1430_v15 = vpop.f32.mrb[13].mxu0 }
 0x130   : > { %v1458_v16 = vpop.f32.mrb[13].mxu1  ;;  %v1054_v17 = vadd.f32 %v1043_v11, %v1040_v9  ;;  %v1064_v18 = vmul.f32 %v1043_v11, %v1043_v11  ;;  %v1343_v19 = vpack.c.bf16 %v1043_v11, %v1040_v9  ;;  %v1431_v20 = vadd.f32 %v1430_v15, %v1429_v12  ;;  %v1432_v21 = vpop.f32.mrb[14].mxu0 }
 0x131   : > { %v1460_v22 = vpop.f32.mrb[14].mxu1  ;;  %v1459_v23 = vadd.f32 %v1458_v16, %v1457_v13  ;;  %v1433_v24 = vpop.f32.mrb[15].mxu0 }
 0x132   : > { %v1461_v25 = vpop.f32.mrb[15].mxu1  ;;  %v1067_v26 = vadd.f32 %v1064_v18, %v1063_v14  ;;  %1344 = vst [vmem:[%s241_s27] sm:$0xff] %v1343_v19   ;;  %v999_v27 = vadd.f32 %v1431_v20, %v950_v57  ;;  %v1434_v28 = vadd.f32 %v1433_v24, %v1432_v21 }
 0x133   : > { %v1462_v29 = vadd.f32 %v1461_v25, %v1460_v22 }
 0x134   : > { %v1048_v30 = vadd.f32 %v1459_v23, %v999_v27  ;;  %v1002_v31 = vadd.f32 %v1434_v28, %v953_v59 }
 0x136   : > { %v1055_v32 = vadd.f32 %v1054_v17, %v1048_v30  ;;  %v1065_v33 = vmul.f32 %v1048_v30, %v1048_v30  ;;  %v1051_v34 = vadd.f32 %v1462_v29, %v1002_v31 }
 0x138   : > { %v1068_v35 = vadd.f32 %v1067_v26, %v1065_v33  ;;  %v1056_v36 = vadd.f32 %v1055_v32, %v1051_v34  ;;  %v1066_v37 = vmul.f32 %v1051_v34, %v1051_v34  ;;  %v1348_v38 = vpack.c.bf16 %v1051_v34, %v1048_v30 }
 0x13a   : > { %v1057_v39 = vrot.slane %v1056_v36, 4  ;;  %v1069_v40 = vadd.f32 %v1068_v35, %v1066_v37  ;;  %1350 = vst [vmem:[%s241_s27 + $0x8] sm:$0xff] %v1348_v38  }
 0x13c   : > { %v1058_v41 = vadd.f32 %v1057_v39, %v1056_v36  ;;  %v1070_v42 = vrot.slane %v1069_v40, 4 }
 0x13e   : > { %v1059_v43 = vrot.slane %v1058_v41, 2  ;;  %v1071_v44 = vadd.f32 %v1070_v42, %v1069_v40 }
 0x140   : > { %v1060_v45 = vadd.f32 %v1059_v43, %v1058_v41  ;;  %v1072_v46 = vrot.slane %v1071_v44, 2 }
 0x142   : > { %v1061_v47 = vrot.slane %v1060_v45, 1  ;;  %v1073_v48 = vadd.f32 %v1072_v46, %v1071_v44 }
 0x144   : > { %v1074_v49 = vrot.slane %v1073_v48, 1  ;;  %v1062_v50 = vadd.f32 %v1061_v47, %v1060_v45 }
 0x146   : > { %v1075_v51 = vadd.f32 %v1074_v49, %v1073_v48 }
 0x148   : > { %v1077_v52 = vsel %vm1076_vm0, %v1062_v50, %v1075_v51 }
 0x149   : > { %1078 = vst [vmem:[%s247_s4] sm:$0x3] %v1077_v52 }
 0x14a PF: > { %s14_s14 = sadd.s32 1, %s1573_s14   ;;  %s1728_s12 = smov %s1569_s13 }
 0x14b   : > { %p11_p5 = scmp.ge.s32.totalorder %s14_s14, 6   ;;  %s1729_s13 = smov %s1731_s15 }
 0x14d   :  { %13 = sbr.rel (!%p11_p5) target bundleno = 2 (0x2), region = 73 }

// kernel: a_call__.6
= control target key start
LH: loop header
LB: loop body
LE: loop exit
PB: predicated region body
PF: predicated region fallthrough
CT: control target
= control target key end

     0   :  { %s1559_s12 = smov 0   ;;  %s1561_s13 = smov 0   ;;  %s1709_s0 = inlined_call_operand.vmem [shape: bf16[4,128,512], index: 0, kind: input, shape index: {}]   ;;  %s1710_s1 = inlined_call_operand.vmem [shape: bf16[4,512,128], index: 1, kind: input, shape index: {}]   ;;  %s1711_s2 = inlined_call_operand.vmem [shape: bf16[4,128,64], index: 2, kind: output, shape index: {0}]   ;;  %s1712_s3 = inlined_call_operand.vmem [shape: f32[4,2,128], index: 3, kind: output, shape index: {1}]  }
   0x1   :  { %s1563_s14 = smov 0  }
   0x2 LB: > { %s26_s15 = sadd.s32 1, %s1533_s13  ;;  %p1174_p0 = scmp.ge.s32.totalorder %s1537_s14, 1  ;;  %s1537_s14 = sphi %s1563_s14, %s14_s14   ;;  %s1533_s13 = sphi %s1561_s13, %s1714_s13   ;;  %s1529_s12 = sphi %s1559_s12, %s1713_s12  }
   0x3   : > { %p28_p1 = scmp.ge.s32.totalorder %s26_s15, 4  ;;  %p174_p2 = scmp.lt.s32.totalorder %s1537_s14, 5 }
   0x5   : > { %s1716_s15 = smov (%p28_p1, %s26_s15), 0  ;;  %p175_p3 = pnand %p1174_p0, %p174_p2 }
   0x6   : > { %p218_p4 = scmp.lt.s32.totalorder (!%p175_p3), %s1529_s12, 3  ;;  %vm1017_vm0 = vcmask (!%p175_p3), 519168   ;;  %vm950_vm1 = vcmask (!%p175_p3), 1040384  }
   0x7   : > { %178 = sbr.rel (%p175_p3) target bundleno = 345 (0x159), region = 28 }
   0xe   : > { %s1718_s12 = smov (!%p218_p4, %s1529_s12), 3 }
   0xf   : > { %s1264_s16 = sshll.u32 %s1718_s12, 8  ;;  %s1266_s23 = sshll.u32 %s1718_s12, 6 }
  0x10   : > { %s1585_s19 = scalar_lea.vmem %s1710_s1, %s1264_s16  ;;  %s1622_s22 = scalar_lea.vmem %s1709_s0, %s1264_s16 }
  0x11   : > { %v1435_v0 = vld [vmem:[%s1585_s19 + $0x40] sm:$0xff]   ;;  %v1439_v4 = vld [vmem:[%s1585_s19 + $0x48] sm:$0xff]   ;;  %v1443_v8 = vld [vmem:[%s1585_s19 + $0x50] sm:$0xff]   ;;  %s1662_s26 = scalar_lea.vmem %s1711_s2, %s1266_s23  ;;  %s1181_s27 = sshll.u32 %s1718_s12, 1 }
  0x12   : > { %v1436_v1 = vld [vmem:[%s1585_s19 + $0xc0] sm:$0xff]   ;;  %1283 = vmatprep.subr.bf16.mxu0 %v1435_v0  ;;  %v1440_v5 = vld [vmem:[%s1585_s19 + $0xc8] sm:$0xff]   ;;  %v1444_v9 = vld [vmem:[%s1585_s19 + $0xd0] sm:$0xff]   ;;  %s247_s30 = scalar_lea.vmem %s1712_s3, %s1181_s27 }
  0x13   : > { %v1437_v2 = vld [vmem:[%s1585_s19] sm:$0xff]   ;;  %1347 = vmatprep.subr.bf16.mxu1 %v1436_v1  ;;  %v1441_v6 = vld [vmem:[%s1585_s19 + $0x8] sm:$0xff]   ;;  %v1445_v10 = vld [vmem:[%s1585_s19 + $0x10] sm:$0xff]  }
  0x14   : > { %v1438_v3 = vld [vmem:[%s1585_s19 + $0x80] sm:$0xff]   ;;  %1284 = vmatpush3.bf16.msra.mxu0 %v1437_v2  ;;  %v1442_v7 = vld [vmem:[%s1585_s19 + $0x88] sm:$0xff]   ;;  %v1446_v11 = vld [vmem:[%s1585_s19 + $0x90] sm:$0xff]  }
  0x15   : > { %1348 = vmatpush3.bf16.msra.mxu1 %v1438_v3  ;;  %1285 = vmatprep.subr.bf16.mxu0 %v1439_v4  ;;  %v1447_v12 = vld [vmem:[%s1585_s19 + $0x58] sm:$0xff]   ;;  %v1451_v16 = vld [vmem:[%s1585_s19 + $0x60] sm:$0xff]   ;;  %v1455_v20 = vld [vmem:[%s1585_s19 + $0x68] sm:$0xff]  }
  0x16   : > { %1349 = vmatprep.subr.bf16.mxu1 %v1440_v5  ;;  %v1448_v13 = vld [vmem:[%s1585_s19 + $0xd8] sm:$0xff]   ;;  %v1452_v17 = vld [vmem:[%s1585_s19 + $0xe0] sm:$0xff]   ;;  %v1456_v21 = vld [vmem:[%s1585_s19 + $0xe8] sm:$0xff]  }
  0x17   : > { %v1449_v14 = vld [vmem:[%s1585_s19 + $0x18] sm:$0xff]   ;;  %v1453_v18 = vld [vmem:[%s1585_s19 + $0x20] sm:$0xff]   ;;  %v1457_v22 = vld [vmem:[%s1585_s19 + $0x28] sm:$0xff]  }
  0x18   : > { %1286 = vmatpush3.bf16.msra.mxu0 %v1441_v6  ;;  %v1450_v15 = vld [vmem:[%s1585_s19 + $0x98] sm:$0xff]   ;;  %v1454_v19 = vld [vmem:[%s1585_s19 + $0xa0] sm:$0xff]   ;;  %v1458_v23 = vld [vmem:[%s1585_s19 + $0xa8] sm:$0xff]  }
  0x19   : > { %1350 = vmatpush3.bf16.msra.mxu1 %v1442_v7  ;;  %1287 = vmatprep.subr.bf16.mxu0 %v1443_v8  ;;  %v1459_v24 = vld [vmem:[%s1585_s19 + $0x70] sm:$0xff]   ;;  %v1463_v28 = vld [vmem:[%s1585_s19 + $0x78] sm:$0xff]  }
  0x1a   : > { %1351 = vmatprep.subr.bf16.mxu1 %v1444_v9  ;;  %v1460_v25 = vld [vmem:[%s1585_s19 + $0xf0] sm:$0xff]   ;;  %v1464_v29 = vld [vmem:[%s1585_s19 + $0xf8] sm:$0xff]  }
  0x1b   : > { %v1461_v26 = vld [vmem:[%s1585_s19 + $0x30] sm:$0xff]   ;;  %v1465_v30 = vld [vmem:[%s1585_s19 + $0x38] sm:$0xff]  }
  0x1c   : > { %1288 = vmatpush3.bf16.msra.mxu0 %v1445_v10  ;;  %v1462_v27 = vld [vmem:[%s1585_s19 + $0xb0] sm:$0xff]   ;;  %v1466_v31 = vld [vmem:[%s1585_s19 + $0xb8] sm:$0xff]  }
  0x1d   : > { %1352 = vmatpush3.bf16.msra.mxu1 %v1446_v11  ;;  %1289 = vmatprep.subr.bf16.mxu0 %v1447_v12  ;;  %v1467_v32 = vld [vmem:[%s1622_s22] ss:$16 sps:$4 sm:$0xff]   ;;  %v1469_v33 = vld [vmem:[%s1622_s22 + $0x4] ss:$16 sps:$4 sm:$0xff]   ;;  %v1470_v34 = vld [vmem:[%s1622_s22 + $0x8] ss:$16 sps:$4 sm:$0xff]  }
  0x1e   : > { %1353 = vmatprep.subr.bf16.mxu1 %v1448_v13  ;;  %v1472_v35 = vld [vmem:[%s1622_s22 + $0xc] ss:$16 sps:$4 sm:$0xff]   ;;  %730 = vmatprep.mubr.bf16.mxu0 %v1469_v33  ;;  %v1473_v36 = vld [vmem:[%s1622_s22 + $0x24] ss:$16 sps:$4 sm:$0xff]   ;;  %v1477_v38 = vld [vmem:[%s1622_s22 + $0x20] ss:$16 sps:$4 sm:$0xff]  }
  0x1f   : > { %827 = vmatprep.mubr.bf16.mxu1 %v1472_v35  ;;  %v1475_v37 = vld [vmem:[%s1622_s22 + $0x2c] ss:$16 sps:$4 sm:$0xff]   ;;  %v1478_v39 = vld [vmem:[%s1622_s22 + $0x28] ss:$16 sps:$4 sm:$0xff]   ;;  %v1479_v40 = vld [vmem:[%s1622_s22 + $0x44] ss:$16 sps:$4 sm:$0xff]  }
  0x20   : > { %1290 = vmatpush3.bf16.msra.mxu0 %v1449_v14  ;;  %v1481_v41 = vld [vmem:[%s1622_s22 + $0x4c] ss:$16 sps:$4 sm:$0xff]   ;;  %v1483_v42 = vld [vmem:[%s1622_s22 + $0x40] ss:$16 sps:$4 sm:$0xff]   ;;  %v1484_v43 = vld [vmem:[%s1622_s22 + $0x48] ss:$16 sps:$4 sm:$0xff]  }
  0x21   : > { %1354 = vmatpush3.bf16.msra.mxu1 %v1450_v15  ;;  %1291 = vmatprep.subr.bf16.mxu0 %v1451_v16  ;;  %v1485_v44 = vld [vmem:[%s1622_s22 + $0x64] ss:$16 sps:$4 sm:$0xff]   ;;  %v1487_v45 = vld [vmem:[%s1622_s22 + $0x6c] ss:$16 sps:$4 sm:$0xff]   ;;  %v1489_v46 = vld [vmem:[%s1622_s22 + $0x60] ss:$16 sps:$4 sm:$0xff]  }
  0x22   : > { %1355 = vmatprep.subr.bf16.mxu1 %v1452_v17  ;;  %v1490_v47 = vld [vmem:[%s1622_s22 + $0x68] ss:$16 sps:$4 sm:$0xff]   ;;  %v1491_v48 = vld [vmem:[%s1622_s22 + $0x84] ss:$16 sps:$4 sm:$0xff]   ;;  %v1493_v49 = vld [vmem:[%s1622_s22 + $0x8c] ss:$16 sps:$4 sm:$0xff]  }
  0x23   : > { %v1495_v50 = vld [vmem:[%s1622_s22 + $0x80] ss:$16 sps:$4 sm:$0xff]   ;;  %v1496_v51 = vld [vmem:[%s1622_s22 + $0x88] ss:$16 sps:$4 sm:$0xff]   ;;  %v1497_v52 = vld [vmem:[%s1622_s22 + $0xa4] ss:$16 sps:$4 sm:$0xff]  }
  0x24   : > { %1292 = vmatpush3.bf16.msra.mxu0 %v1453_v18  ;;  %v1499_v53 = vld [vmem:[%s1622_s22 + $0xac] ss:$16 sps:$4 sm:$0xff]   ;;  %v1501_v54 = vld [vmem:[%s1622_s22 + $0xa0] ss:$16 sps:$4 sm:$0xff]   ;;  %v1502_v55 = vld [vmem:[%s1622_s22 + $0xa8] ss:$16 sps:$4 sm:$0xff]  }
  0x25   : > { %1356 = vmatpush3.bf16.msra.mxu1 %v1454_v19  ;;  %1293 = vmatprep.subr.bf16.mxu0 %v1455_v20  ;;  %v1503_v56 = vld [vmem:[%s1622_s22 + $0xc4] ss:$16 sps:$4 sm:$0xff]   ;;  %v1505_v57 = vld [vmem:[%s1622_s22 + $0xcc] ss:$16 sps:$4 sm:$0xff]   ;;  %v1507_v58 = vld [vmem:[%s1622_s22 + $0xc0] ss:$16 sps:$4 sm:$0xff]  }
  0x26   : > { %1357 = vmatprep.subr.bf16.mxu1 %v1456_v21  ;;  %v1508_v59 = vld [vmem:[%s1622_s22 + $0xc8] ss:$16 sps:$4 sm:$0xff]   ;;  %v1509_v60 = vld [vmem:[%s1622_s22 + $0xe4] ss:$16 sps:$4 sm:$0xff]   ;;  %v1511_v61 = vld [vmem:[%s1622_s22 + $0xec] ss:$16 sps:$4 sm:$0xff]  }
  0x27   : > { %v1513_v62 = vld [vmem:[%s1622_s22 + $0xe0] ss:$16 sps:$4 sm:$0xff]   ;;  %v1514_v63 = vld [vmem:[%s1622_s22 + $0xe8] ss:$16 sps:$4 sm:$0xff]  }
  0x28   : > { %1294 = vmatpush3.bf16.msra.mxu0 %v1457_v22 }
  0x29   : > { %1358 = vmatpush3.bf16.msra.mxu1 %v1458_v23  ;;  %1295 = vmatprep.subr.bf16.mxu0 %v1459_v24 }
  0x2a   : > { %1359 = vmatprep.subr.bf16.mxu1 %v1460_v25 }
  0x2c   : > { %1296 = vmatpush3.bf16.msra.mxu0 %v1461_v26 }
  0x2d   : > { %1360 = vmatpush3.bf16.msra.mxu1 %v1462_v27  ;;  %1297 = vmatprep.subr.bf16.mxu0 %v1463_v28 }
  0x2e   : > { %1361 = vmatprep.subr.bf16.mxu1 %v1464_v29 }
  0x30   : > { %1298 = vmatpush3.bf16.msra.mxu0 %v1465_v30 }
  0x31   : > { %1362 = vmatpush3.bf16.msra.mxu1 %v1466_v31 }
  0x33   : > { %731 = vmatmul.mubr.bf16.vlgmr.msra.gmra.mrb[0].mxu0 %v1467_v32 }
  0x34   : > { %828 = vmatmul.mubr.bf16.vlgmr.msra.gmra.mrb[0].mxu1 %v1470_v34  ;;  %738 = vmatprep.mubr.bf16.mxu0 %v1473_v36 }
  0x35   : > { %835 = vmatprep.mubr.bf16.mxu1 %v1475_v37 }
  0x3b   : > { %739 = vmatmul.mubr.bf16.gmra.mrb[4].mxu0 %v1477_v38 }
  0x3c   : > { %836 = vmatmul.mubr.bf16.gmra.mrb[4].mxu1 %v1478_v39  ;;  %746 = vmatprep.mubr.bf16.mxu0 %v1479_v40 }
  0x3d   : > { %843 = vmatprep.mubr.bf16.mxu1 %v1481_v41 }
  0x43   : > { %747 = vmatmul.mubr.bf16.gmra.mrb[8].mxu0 %v1483_v42 }
  0x44   : > { %844 = vmatmul.mubr.bf16.gmra.mrb[8].mxu1 %v1484_v43  ;;  %754 = vmatprep.mubr.bf16.mxu0 %v1485_v44 }
  0x45   : > { %851 = vmatprep.mubr.bf16.mxu1 %v1487_v45 }
  0x4b   : > { %755 = vmatmul.mubr.bf16.gmra.mrb[12].mxu0 %v1489_v46 }
  0x4c   : > { %852 = vmatmul.mubr.bf16.gmra.mrb[12].mxu1 %v1490_v47  ;;  %762 = vmatprep.mubr.bf16.mxu0 %v1491_v48 }
  0x4d   : > { %859 = vmatprep.mubr.bf16.mxu1 %v1493_v49 }
  0x53   : > { %763 = vmatmul.mubr.bf16.gmra.mrb[16].mxu0 %v1495_v50 }
  0x54   : > { %860 = vmatmul.mubr.bf16.gmra.mrb[16].mxu1 %v1496_v51  ;;  %770 = vmatprep.mubr.bf16.mxu0 %v1497_v52 }
  0x55   : > { %867 = vmatprep.mubr.bf16.mxu1 %v1499_v53 }
  0x5b   : > { %771 = vmatmul.mubr.bf16.gmra.mrb[20].mxu0 %v1501_v54 }
  0x5c   : > { %868 = vmatmul.mubr.bf16.gmra.mrb[20].mxu1 %v1502_v55  ;;  %778 = vmatprep.mubr.bf16.mxu0 %v1503_v56 }
  0x5d   : > { %875 = vmatprep.mubr.bf16.mxu1 %v1505_v57 }
  0x63   : > { %779 = vmatmul.mubr.bf16.gmra.mrb[24].mxu0 %v1507_v58 }
  0x64   : > { %876 = vmatmul.mubr.bf16.gmra.mrb[24].mxu1 %v1508_v59  ;;  %786 = vmatprep.mubr.bf16.mxu0 %v1509_v60 }
  0x65   : > { %883 = vmatprep.mubr.bf16.mxu1 %v1511_v61 }
  0x6b   : > { %787 = vmatmul.mubr.bf16.gmra.mrb[28].mxu0 %v1513_v62 }
  0x6c   : > { %884 = vmatmul.mubr.bf16.gmra.mrb[28].mxu1 %v1514_v63 }
 0x106   : > { %v1299_v0 = vpop.f32.mrb[0].mxu0 }
 0x107   : > { %v1363_v1 = vpop.f32.mrb[0].mxu1  ;;  %v1300_v2 = vpop.f32.mrb[1].mxu0 }
 0x108   : > { %v1301_v3 = vadd.f32 %v1300_v2, %v1299_v0  ;;  %v1364_v4 = vpop.f32.mrb[1].mxu1  ;;  %v1302_v5 = vpop.f32.mrb[2].mxu0 }
 0x109   : > { %v1365_v6 = vadd.f32 %v1364_v4, %v1363_v1  ;;  %v1366_v7 = vpop.f32.mrb[2].mxu1  ;;  %v1303_v8 = vpop.f32.mrb[3].mxu0 }
 0x10a   : > { %v1304_v9 = vadd.f32 %v1303_v8, %v1302_v5  ;;  %v1367_v10 = vpop.f32.mrb[3].mxu1 }
 0x10b   : > { %v830_v11 = vadd.f32 %v1365_v6, %v1301_v3  ;;  %v1368_v12 = vadd.f32 %v1367_v10, %v1366_v7 }
 0x10d   : > { %v1267_v13 = vpack.c.bf16 %v830_v11, %v830_v11  ;;  %v833_v14 = vadd.f32 %v1368_v12, %v1304_v9  ;;  %v913_v16 = vmul.f32 %v830_v11, %v830_v11 }
 0x10e   : > { %v1305_v15 = vpop.f32.mrb[4].mxu0 }
 0x10f   : > { %1018 = vst.msk [vmem:[%s1662_s26] sm:$0xf] %vm1017_vm0, %v1267_v13  ;;  %v892_v17 = vadd.f32 %v833_v14, %v830_v11  ;;  %v914_v18 = vmul.f32 %v833_v14, %v833_v14  ;;  %v1268_v19 = vpack.c.bf16 %v833_v14, %v833_v14  ;;  %v1369_v20 = vpop.f32.mrb[4].mxu1  ;;  %v1306_v21 = vpop.f32.mrb[5].mxu0 }
 0x110   : > { %v1307_v22 = vadd.f32 %v1306_v21, %v1305_v15  ;;  %v1370_v23 = vpop.f32.mrb[5].mxu1  ;;  %v1308_v24 = vpop.f32.mrb[6].mxu0 }
 0x111   : > { %v929_v25 = vadd.f32 %v914_v18, %v913_v16  ;;  %1019 = vst.msk [vmem:[%s1662_s26 + $0x4] sm:$0xf] %vm1017_vm0, %v1268_v19  ;;  %v1371_v26 = vadd.f32 %v1370_v23, %v1369_v20  ;;  %v1372_v27 = vpop.f32.mrb[6].mxu1  ;;  %v1309_v28 = vpop.f32.mrb[7].mxu0 }
 0x112   : > { %v1310_v29 = vadd.f32 %v1309_v28, %v1308_v24  ;;  %v1373_v30 = vpop.f32.mrb[7].mxu1 }
 0x113   : > { %v838_v31 = vadd.f32 %v1371_v26, %v1307_v22  ;;  %v1374_v32 = vadd.f32 %v1373_v30, %v1372_v27 }
 0x115   : > { %v893_v33 = vadd.f32 %v892_v17, %v838_v31  ;;  %v915_v34 = vmul.f32 %v838_v31, %v838_v31  ;;  %v1269_v35 = vpack.c.bf16 %v838_v31, %v838_v31  ;;  %v841_v36 = vadd.f32 %v1374_v32, %v1310_v29 }
 0x116   : > { %v1311_v37 = vpop.f32.mrb[8].mxu0 }
 0x117   : > { %v930_v38 = vadd.f32 %v929_v25, %v915_v34  ;;  %1020 = vst.msk [vmem:[%s1662_s26 + $0x8] sm:$0xf] %vm1017_vm0, %v1269_v35  ;;  %v894_v39 = vadd.f32 %v893_v33, %v841_v36  ;;  %v916_v40 = vmul.f32 %v841_v36, %v841_v36  ;;  %v1270_v41 = vpack.c.bf16 %v841_v36, %v841_v36  ;;  %v1375_v42 = vpop.f32.mrb[8].mxu1  ;;  %v1312_v43 = vpop.f32.mrb[9].mxu0 }
 0x118   : > { %v1313_v44 = vadd.f32 %v1312_v43, %v1311_v37  ;;  %v1376_v45 = vpop.f32.mrb[9].mxu1  ;;  %v1314_v46 = vpop.f32.mrb[10].mxu0 }
 0x119   : > { %v931_v47 = vadd.f32 %v930_v38, %v916_v40  ;;  %1021 = vst.msk [vmem:[%s1662_s26 + $0xc] sm:$0xf] %vm1017_vm0, %v1270_v41  ;;  %v1377_v48 = vadd.f32 %v1376_v45, %v1375_v42  ;;  %v1378_v49 = vpop.f32.mrb[10].mxu1  ;;  %v1315_v50 = vpop.f32.mrb[11].mxu0 }
 0x11a   : > { %v1316_v51 = vadd.f32 %v1315_v50, %v1314_v46  ;;  %v1379_v52 = vpop.f32.mrb[11].mxu1 }
 0x11b   : > { %v846_v53 = vadd.f32 %v1377_v48, %v1313_v44  ;;  %v1380_v54 = vadd.f32 %v1379_v52, %v1378_v49 }
 0x11d   : > { %v895_v55 = vadd.f32 %v894_v39, %v846_v53  ;;  %v917_v56 = vmul.f32 %v846_v53, %v846_v53  ;;  %v1271_v57 = vpack.c.bf16 %v846_v53, %v846_v53  ;;  %v849_v58 = vadd.f32 %v1380_v54, %v1316_v51 }
 0x11e   : > { %v1317_v59 = vpop.f32.mrb[12].mxu0 }
 0x11f   : > { %v932_v60 = vadd.f32 %v931_v47, %v917_v56  ;;  %1022 = vst.msk [vmem:[%s1662_s26 + $0x10] sm:$0xf] %vm1017_vm0, %v1271_v57  ;;  %v896_v61 = vadd.f32 %v895_v55, %v849_v58  ;;  %v918_v62 = vmul.f32 %v849_v58, %v849_v58  ;;  %v1272_v63 = vpack.c.bf16 %v849_v58, %v849_v58  ;;  %v1381_v0 = vpop.f32.mrb[12].mxu1  ;;  %v1318_v1 = vpop.f32.mrb[13].mxu0 }
 0x120   : > { %v1319_v2 = vadd.f32 %v1318_v1, %v1317_v59  ;;  %v1382_v3 = vpop.f32.mrb[13].mxu1  ;;  %v1320_v4 = vpop.f32.mrb[14].mxu0 }
 0x121   : > { %v933_v5 = vadd.f32 %v932_v60, %v918_v62  ;;  %1023 = vst.msk [vmem:[%s1662_s26 + $0x14] sm:$0xf] %vm1017_vm0, %v1272_v63  ;;  %v1383_v6 = vadd.f32 %v1382_v3, %v1381_v0  ;;  %v1384_v7 = vpop.f32.mrb[14].mxu1  ;;  %v1321_v8 = vpop.f32.mrb[15].mxu0 }
 0x122   : > { %v1322_v9 = vadd.f32 %v1321_v8, %v1320_v4  ;;  %v1385_v10 = vpop.f32.mrb[15].mxu1 }
 0x123   : > { %v854_v11 = vadd.f32 %v1383_v6, %v1319_v2  ;;  %v1386_v12 = vadd.f32 %v1385_v10, %v1384_v7 }
 0x125   : > { %v897_v13 = vadd.f32 %v896_v61, %v854_v11  ;;  %v919_v14 = vmul.f32 %v854_v11, %v854_v11  ;;  %v1273_v15 = vpack.c.bf16 %v854_v11, %v854_v11  ;;  %v857_v16 = vadd.f32 %v1386_v12, %v1322_v9 }
 0x126   : > { %v1323_v17 = vpop.f32.mrb[16].mxu0 }
 0x127   : > { %v934_v18 = vadd.f32 %v933_v5, %v919_v14  ;;  %1024 = vst.msk [vmem:[%s1662_s26 + $0x18] sm:$0xf] %vm1017_vm0, %v1273_v15  ;;  %v898_v19 = vadd.f32 %v897_v13, %v857_v16  ;;  %v920_v20 = vmul.f32 %v857_v16, %v857_v16  ;;  %v1274_v21 = vpack.c.bf16 %v857_v16, %v857_v16  ;;  %v1387_v22 = vpop.f32.mrb[16].mxu1  ;;  %v1324_v23 = vpop.f32.mrb[17].mxu0 }
 0x128   : > { %v1325_v24 = vadd.f32 %v1324_v23, %v1323_v17  ;;  %v1388_v25 = vpop.f32.mrb[17].mxu1  ;;  %v1326_v26 = vpop.f32.mrb[18].mxu0 }
 0x129   : > { %v935_v27 = vadd.f32 %v934_v18, %v920_v20  ;;  %1025 = vst.msk [vmem:[%s1662_s26 + $0x1c] sm:$0xf] %vm1017_vm0, %v1274_v21  ;;  %v1389_v28 = vadd.f32 %v1388_v25, %v1387_v22  ;;  %v1390_v29 = vpop.f32.mrb[18].mxu1  ;;  %v1327_v30 = vpop.f32.mrb[19].mxu0 }
 0x12a   : > { %v1328_v31 = vadd.f32 %v1327_v30, %v1326_v26  ;;  %v1391_v32 = vpop.f32.mrb[19].mxu1 }
 0x12b   : > { %v862_v33 = vadd.f32 %v1389_v28, %v1325_v24  ;;  %v1392_v34 = vadd.f32 %v1391_v32, %v1390_v29 }
 0x12d   : > { %v899_v35 = vadd.f32 %v898_v19, %v862_v33  ;;  %v921_v36 = vmul.f32 %v862_v33, %v862_v33  ;;  %v1275_v37 = vpack.c.bf16 %v862_v33, %v862_v33  ;;  %v865_v38 = vadd.f32 %v1392_v34, %v1328_v31 }
 0x12e   : > { %v1329_v39 = vpop.f32.mrb[20].mxu0 }
 0x12f   : > { %v936_v40 = vadd.f32 %v935_v27, %v921_v36  ;;  %1026 = vst.msk [vmem:[%s1662_s26 + $0x20] sm:$0xf] %vm1017_vm0, %v1275_v37  ;;  %v900_v41 = vadd.f32 %v899_v35, %v865_v38  ;;  %v922_v42 = vmul.f32 %v865_v38, %v865_v38  ;;  %v1276_v43 = vpack.c.bf16 %v865_v38, %v865_v38  ;;  %v1393_v44 = vpop.f32.mrb[20].mxu1  ;;  %v1330_v45 = vpop.f32.mrb[21].mxu0 }
 0x130   : > { %v1331_v46 = vadd.f32 %v1330_v45, %v1329_v39  ;;  %v1394_v47 = vpop.f32.mrb[21].mxu1  ;;  %v1332_v48 = vpop.f32.mrb[22].mxu0 }
 0x131   : > { %v937_v49 = vadd.f32 %v936_v40, %v922_v42  ;;  %1027 = vst.msk [vmem:[%s1662_s26 + $0x24] sm:$0xf] %vm1017_vm0, %v1276_v43  ;;  %v1395_v50 = vadd.f32 %v1394_v47, %v1393_v44  ;;  %v1396_v51 = vpop.f32.mrb[22].mxu1  ;;  %v1333_v52 = vpop.f32.mrb[23].mxu0 }
 0x132   : > { %v1334_v53 = vadd.f32 %v1333_v52, %v1332_v48  ;;  %v1397_v54 = vpop.f32.mrb[23].mxu1 }
 0x133   : > { %v870_v55 = vadd.f32 %v1395_v50, %v1331_v46  ;;  %v1398_v56 = vadd.f32 %v1397_v54, %v1396_v51 }
 0x135   : > { %v901_v57 = vadd.f32 %v900_v41, %v870_v55  ;;  %v923_v58 = vmul.f32 %v870_v55, %v870_v55  ;;  %v1277_v59 = vpack.c.bf16 %v870_v55, %v870_v55  ;;  %v873_v60 = vadd.f32 %v1398_v56, %v1334_v53 }
 0x136   : > { %v1335_v61 = vpop.f32.mrb[24].mxu0 }
 0x137   : > { %v938_v62 = vadd.f32 %v937_v49, %v923_v58  ;;  %1028 = vst.msk [vmem:[%s1662_s26 + $0x28] sm:$0xf] %vm1017_vm0, %v1277_v59  ;;  %v902_v63 = vadd.f32 %v901_v57, %v873_v60  ;;  %v924_v0 = vmul.f32 %v873_v60, %v873_v60  ;;  %v1278_v1 = vpack.c.bf16 %v873_v60, %v873_v60  ;;  %v1399_v2 = vpop.f32.mrb[24].mxu1  ;;  %v1336_v3 = vpop.f32.mrb[25].mxu0 }
 0x138   : > { %v1337_v4 = vadd.f32 %v1336_v3, %v1335_v61  ;;  %v1400_v5 = vpop.f32.mrb[25].mxu1  ;;  %v1338_v6 = vpop.f32.mrb[26].mxu0 }
 0x139   : > { %v939_v7 = vadd.f32 %v938_v62, %v924_v0  ;;  %1029 = vst.msk [vmem:[%s1662_s26 + $0x2c] sm:$0xf] %vm1017_vm0, %v1278_v1  ;;  %v1401_v8 = vadd.f32 %v1400_v5, %v1399_v2  ;;  %v1402_v9 = vpop.f32.mrb[26].mxu1  ;;  %v1339_v10 = vpop.f32.mrb[27].mxu0 }
 0x13a   : > { %v1340_v11 = vadd.f32 %v1339_v10, %v1338_v6  ;;  %v1403_v12 = vpop.f32.mrb[27].mxu1 }
 0x13b   : > { %v878_v13 = vadd.f32 %v1401_v8, %v1337_v4  ;;  %v1404_v14 = vadd.f32 %v1403_v12, %v1402_v9 }
 0x13d   : > { %v903_v15 = vadd.f32 %v902_v63, %v878_v13  ;;  %v925_v16 = vmul.f32 %v878_v13, %v878_v13  ;;  %v1279_v17 = vpack.c.bf16 %v878_v13, %v878_v13  ;;  %v881_v18 = vadd.f32 %v1404_v14, %v1340_v11 }
 0x13e   : > { %v1341_v19 = vpop.f32.mrb[28].mxu0 }
 0x13f   : > { %v940_v20 = vadd.f32 %v939_v7, %v925_v16  ;;  %1030 = vst.msk [vmem:[%s1662_s26 + $0x30] sm:$0xf] %vm1017_vm0, %v1279_v17  ;;  %v904_v21 = vadd.f32 %v903_v15, %v881_v18  ;;  %v926_v22 = vmul.f32 %v881_v18, %v881_v18  ;;  %v1280_v23 = vpack.c.bf16 %v881_v18, %v881_v18  ;;  %v1405_v24 = vpop.f32.mrb[28].mxu1  ;;  %v1342_v25 = vpop.f32.mrb[29].mxu0 }
 0x140   : > { %v1343_v26 = vadd.f32 %v1342_v25, %v1341_v19  ;;  %v1406_v27 = vpop.f32.mrb[29].mxu1  ;;  %v1344_v28 = vpop.f32.mrb[30].mxu0 }
 0x141   : > { %v941_v29 = vadd.f32 %v940_v20, %v926_v22  ;;  %1031 = vst.msk [vmem:[%s1662_s26 + $0x34] sm:$0xf] %vm1017_vm0, %v1280_v23  ;;  %v1407_v30 = vadd.f32 %v1406_v27, %v1405_v24  ;;  %v1408_v31 = vpop.f32.mrb[30].mxu1  ;;  %v1345_v32 = vpop.f32.mrb[31].mxu0 }
 0x142   : > { %v1346_v33 = vadd.f32 %v1345_v32, %v1344_v28  ;;  %v1409_v34 = vpop.f32.mrb[31].mxu1 }
 0x143   : > { %v886_v35 = vadd.f32 %v1407_v30, %v1343_v26  ;;  %v1410_v36 = vadd.f32 %v1409_v34, %v1408_v31 }
 0x145   : > { %v905_v37 = vadd.f32 %v904_v21, %v886_v35  ;;  %v927_v38 = vmul.f32 %v886_v35, %v886_v35  ;;  %v1281_v39 = vpack.c.bf16 %v886_v35, %v886_v35  ;;  %v889_v40 = vadd.f32 %v1410_v36, %v1346_v33 }
 0x147   : > { %v942_v41 = vadd.f32 %v941_v29, %v927_v38  ;;  %1032 = vst.msk [vmem:[%s1662_s26 + $0x38] sm:$0xf] %vm1017_vm0, %v1281_v39  ;;  %v906_v42 = vadd.f32 %v905_v37, %v889_v40  ;;  %v928_v43 = vmul.f32 %v889_v40, %v889_v40  ;;  %v1282_v44 = vpack.c.bf16 %v889_v40, %v889_v40 }
 0x149   : > { %v907_v45 = vrot.slane %v906_v42, 4  ;;  %v943_v46 = vadd.f32 %v942_v41, %v928_v43  ;;  %1033 = vst.msk [vmem:[%s1662_s26 + $0x3c] sm:$0xf] %vm1017_vm0, %v1282_v44 }
 0x14b   : > { %v908_v47 = vadd.f32 %v907_v45, %v906_v42  ;;  %v944_v48 = vrot.slane %v943_v46, 4 }
 0x14d   : > { %v909_v49 = vrot.slane %v908_v47, 2  ;;  %v945_v50 = vadd.f32 %v944_v48, %v943_v46 }
 0x14f   : > { %v910_v51 = vadd.f32 %v909_v49, %v908_v47  ;;  %v946_v52 = vrot.slane %v945_v50, 2 }
 0x151   : > { %v911_v53 = vrot.slane %v910_v51, 1  ;;  %v947_v54 = vadd.f32 %v946_v52, %v945_v50 }
 0x153   : > { %v948_v55 = vrot.slane %v947_v54, 1  ;;  %v912_v56 = vadd.f32 %v911_v53, %v910_v51 }
 0x155   : > { %v949_v57 = vadd.f32 %v948_v55, %v947_v54 }
 0x157   : > { %v951_v58 = vsel %vm950_vm1, %v912_v56, %v949_v57 }
 0x158   : > { %952 = vst [vmem:[%s247_s30] sm:$0x3] %v951_v58 }
 0x159 PF: > { %s14_s14 = sadd.s32 1, %s1537_s14   ;;  %s1713_s12 = smov %s1533_s13 }
 0x15a   : > { %p11_p5 = scmp.ge.s32.totalorder %s14_s14, 6   ;;  %s1714_s13 = smov %s1716_s15 }
 0x15c   :  { %13 = sbr.rel (!%p11_p5) target bundleno = 2 (0x2), region = 73 }

// kernel: a_call__.7
= control target key start
LH: loop header
LB: loop body
LE: loop exit
PB: predicated region body
PF: predicated region fallthrough
CT: control target
= control target key end

     0   :  { %s1672_s9 = smov 0   ;;  %s1674_s10 = smov 0   ;;  %s1962_s0 = inlined_call_operand.vmem [shape: bf16[4,512,256], index: 0, kind: input, shape index: {}]   ;;  %s1963_s1 = inlined_call_operand.vmem [shape: bf16[4,256,128], index: 1, kind: input, shape index: {}]   ;;  %s1964_s2 = inlined_call_operand.vmem [shape: f32[4,512,1], index: 2, kind: output, shape index: {}]  }
   0x1   :  { %s1676_s11 = smov 0  }
   0x2 LB: > { %s24_s12 = sadd.s32 1, %s1650_s10  ;;  %p1243_p0 = scmp.ge.s32.totalorder %s1654_s11, 1  ;;  %s1654_s11 = sphi %s1676_s11, %s12_s11   ;;  %s1650_s10 = sphi %s1674_s10, %s1966_s10   ;;  %s1646_s9 = sphi %s1672_s9, %s1965_s9  }
   0x3   : > { %p26_p1 = scmp.ge.s32.totalorder %s24_s12, 4  ;;  %p144_p2 = scmp.lt.s32.totalorder %s1654_s11, 5 }
   0x5   : > { %s1968_s12 = smov (%p26_p1, %s24_s12), 0  ;;  %p145_p3 = pnand %p1243_p0, %p144_p2 }
   0x6   : > { %p181_p4 = scmp.lt.s32.totalorder (!%p145_p3), %s1646_s9, 3  ;;  %v1656_v0 = vmov (!%p145_p3), 0   ;;  %vm1072_vm0 = vcmask (!%p145_p3), 7168  }
   0x7   : > { %148 = sbr.rel (%p145_p3) target bundleno = 428 (0x1ac), region = 28  ;;  %719 = vmatprep.subr.bf16.mxu0 (!%p145_p3), %v1656_v0  ;;  %1335 = vmatprep.subr.bf16.mxu1 (!%p145_p3), %v1656_v0 }
   0xe   : > { %s1970_s9 = smov (!%p181_p4, %s1646_s9), 3 }
   0xf   : > { %s1333_s13 = sshll.u32 %s1970_s9, 7  ;;  %s1332_s17 = sshll.u32 %s1970_s9, 9 }
  0x10   : > { %s1698_s16 = scalar_lea.vmem %s1963_s1, %s1333_s13  ;;  %s1717_s20 = scalar_lea.vmem %s1962_s0, %s1332_s17 }
  0x11   : > { %v1392_v1 = vld [vmem:[%s1698_s16] sm:$0xff]   ;;  %v1393_v2 = vld [vmem:[%s1698_s16 + $0x8] sm:$0xff]   ;;  %v1394_v3 = vld [vmem:[%s1698_s16 + $0x10] sm:$0xff]   ;;  %s1823_s23 = scalar_lea.vmem %s1964_s2, %s1332_s17 }
  0x12   : > { %720 = vmatpush1.bf16.msra.mxu0 %v1392_v1  ;;  %1351 = vmatpush1.bf16.msra.mxu1 %v1392_v1  ;;  %v1395_v4 = vld [vmem:[%s1698_s16 + $0x18] sm:$0xff]   ;;  %v1396_v5 = vld [vmem:[%s1698_s16 + $0x20] sm:$0xff]   ;;  %v1397_v7 = vld [vmem:[%s1698_s16 + $0x28] sm:$0xff]  }
  0x13   : > { %721 = vmatprep.subr.bf16.mxu0 %v1656_v0  ;;  %1336 = vmatprep.subr.bf16.mxu1 %v1656_v0  ;;  %v1410_v6 = vld [vmem:[%s1717_s20 + $0x4] ss:$8 sps:$4 sm:$0xff]   ;;  %v1398_v9 = vld [vmem:[%s1698_s16 + $0x30] sm:$0xff]   ;;  %v1399_v10 = vld [vmem:[%s1698_s16 + $0x38] sm:$0xff]  }
  0x14   : > { %v1413_v8 = vld [vmem:[%s1717_s20 + $0x104] ss:$8 sps:$4 sm:$0xff]   ;;  %751 = vmatprep.mubr.bf16.mxu0 %v1410_v6  ;;  %v1402_v13 = vld [vmem:[%s1698_s16 + $0x50] sm:$0xff]   ;;  %v1403_v14 = vld [vmem:[%s1698_s16 + $0x58] sm:$0xff]  }
  0x15   : > { %879 = vmatprep.mubr.bf16.mxu1 %v1413_v8  ;;  %v1400_v11 = vld [vmem:[%s1698_s16 + $0x40] sm:$0xff]   ;;  %v1401_v12 = vld [vmem:[%s1698_s16 + $0x48] sm:$0xff]   ;;  %v1406_v17 = vld [vmem:[%s1698_s16 + $0x70] sm:$0xff]  }
  0x16   : > { %722 = vmatpush1.bf16.msra.mxu0 %v1393_v2  ;;  %1352 = vmatpush1.bf16.msra.mxu1 %v1393_v2  ;;  %v1404_v15 = vld [vmem:[%s1698_s16 + $0x60] sm:$0xff]   ;;  %v1405_v16 = vld [vmem:[%s1698_s16 + $0x68] sm:$0xff]   ;;  %v1407_v18 = vld [vmem:[%s1698_s16 + $0x78] sm:$0xff]  }
  0x17   : > { %723 = vmatprep.subr.bf16.mxu0 %v1656_v0  ;;  %1337 = vmatprep.subr.bf16.mxu1 %v1656_v0  ;;  %v1408_v19 = vld [vmem:[%s1717_s20] ss:$8 sps:$4 sm:$0xff]   ;;  %v1414_v21 = vld [vmem:[%s1717_s20 + $0x14] ss:$8 sps:$4 sm:$0xff]   ;;  %v1418_v23 = vld [vmem:[%s1717_s20 + $0x10] ss:$8 sps:$4 sm:$0xff]  }
  0x18   : > { %v1411_v20 = vld [vmem:[%s1717_s20 + $0x100] ss:$8 sps:$4 sm:$0xff]   ;;  %v1416_v22 = vld [vmem:[%s1717_s20 + $0x114] ss:$8 sps:$4 sm:$0xff]   ;;  %v1419_v24 = vld [vmem:[%s1717_s20 + $0x110] ss:$8 sps:$4 sm:$0xff]  }
  0x19   : > { %v1420_v25 = vld [vmem:[%s1717_s20 + $0x24] ss:$8 sps:$4 sm:$0xff]   ;;  %v1424_v27 = vld [vmem:[%s1717_s20 + $0x20] ss:$8 sps:$4 sm:$0xff]   ;;  %v1426_v29 = vld [vmem:[%s1717_s20 + $0x34] ss:$8 sps:$4 sm:$0xff]  }
  0x1a   : > { %724 = vmatpush1.bf16.msra.mxu0 %v1394_v3  ;;  %1353 = vmatpush1.bf16.msra.mxu1 %v1394_v3  ;;  %v1422_v26 = vld [vmem:[%s1717_s20 + $0x124] ss:$8 sps:$4 sm:$0xff]   ;;  %v1425_v28 = vld [vmem:[%s1717_s20 + $0x120] ss:$8 sps:$4 sm:$0xff]   ;;  %v1428_v30 = vld [vmem:[%s1717_s20 + $0x134] ss:$8 sps:$4 sm:$0xff]  }
  0x1b   : > { %725 = vmatprep.subr.bf16.mxu0 %v1656_v0  ;;  %1338 = vmatprep.subr.bf16.mxu1 %v1656_v0  ;;  %v1430_v31 = vld [vmem:[%s1717_s20 + $0x30] ss:$8 sps:$4 sm:$0xff]   ;;  %v1432_v33 = vld [vmem:[%s1717_s20 + $0x44] ss:$8 sps:$4 sm:$0xff]   ;;  %v1436_v35 = vld [vmem:[%s1717_s20 + $0x40] ss:$8 sps:$4 sm:$0xff]  }
  0x1c   : > { %v1431_v32 = vld [vmem:[%s1717_s20 + $0x130] ss:$8 sps:$4 sm:$0xff]   ;;  %v1434_v34 = vld [vmem:[%s1717_s20 + $0x144] ss:$8 sps:$4 sm:$0xff]   ;;  %v1437_v36 = vld [vmem:[%s1717_s20 + $0x140] ss:$8 sps:$4 sm:$0xff]  }
  0x1d   : > { %v1438_v37 = vld [vmem:[%s1717_s20 + $0x54] ss:$8 sps:$4 sm:$0xff]   ;;  %v1442_v39 = vld [vmem:[%s1717_s20 + $0x50] ss:$8 sps:$4 sm:$0xff]   ;;  %v1444_v41 = vld [vmem:[%s1717_s20 + $0x64] ss:$8 sps:$4 sm:$0xff]  }
  0x1e   : > { %726 = vmatpush1.bf16.msra.mxu0 %v1395_v4  ;;  %1354 = vmatpush1.bf16.msra.mxu1 %v1395_v4  ;;  %v1440_v38 = vld [vmem:[%s1717_s20 + $0x154] ss:$8 sps:$4 sm:$0xff]   ;;  %v1443_v40 = vld [vmem:[%s1717_s20 + $0x150] ss:$8 sps:$4 sm:$0xff]   ;;  %v1446_v42 = vld [vmem:[%s1717_s20 + $0x164] ss:$8 sps:$4 sm:$0xff]  }
  0x1f   : > { %727 = vmatprep.subr.bf16.mxu0 %v1656_v0  ;;  %1339 = vmatprep.subr.bf16.mxu1 %v1656_v0  ;;  %v1448_v43 = vld [vmem:[%s1717_s20 + $0x60] ss:$8 sps:$4 sm:$0xff]   ;;  %v1450_v45 = vld [vmem:[%s1717_s20 + $0x74] ss:$8 sps:$4 sm:$0xff]   ;;  %v1454_v47 = vld [vmem:[%s1717_s20 + $0x70] ss:$8 sps:$4 sm:$0xff]  }
  0x20   : > { %v1449_v44 = vld [vmem:[%s1717_s20 + $0x160] ss:$8 sps:$4 sm:$0xff]   ;;  %v1452_v46 = vld [vmem:[%s1717_s20 + $0x174] ss:$8 sps:$4 sm:$0xff]   ;;  %v1455_v48 = vld [vmem:[%s1717_s20 + $0x170] ss:$8 sps:$4 sm:$0xff]  }
  0x21   : > { %v1456_v49 = vld [vmem:[%s1717_s20 + $0x84] ss:$8 sps:$4 sm:$0xff]   ;;  %v1460_v51 = vld [vmem:[%s1717_s20 + $0x80] ss:$8 sps:$4 sm:$0xff]   ;;  %v1462_v53 = vld [vmem:[%s1717_s20 + $0x94] ss:$8 sps:$4 sm:$0xff]  }
  0x22   : > { %728 = vmatpush1.bf16.msra.mxu0 %v1396_v5  ;;  %1355 = vmatpush1.bf16.msra.mxu1 %v1396_v5  ;;  %v1458_v50 = vld [vmem:[%s1717_s20 + $0x184] ss:$8 sps:$4 sm:$0xff]   ;;  %v1461_v52 = vld [vmem:[%s1717_s20 + $0x180] ss:$8 sps:$4 sm:$0xff]   ;;  %v1464_v54 = vld [vmem:[%s1717_s20 + $0x194] ss:$8 sps:$4 sm:$0xff]  }
  0x23   : > { %729 = vmatprep.subr.bf16.mxu0 %v1656_v0  ;;  %1340 = vmatprep.subr.bf16.mxu1 %v1656_v0  ;;  %v1466_v55 = vld [vmem:[%s1717_s20 + $0x90] ss:$8 sps:$4 sm:$0xff]   ;;  %v1468_v57 = vld [vmem:[%s1717_s20 + $0xa4] ss:$8 sps:$4 sm:$0xff]   ;;  %v1472_v59 = vld [vmem:[%s1717_s20 + $0xa0] ss:$8 sps:$4 sm:$0xff]  }
  0x24   : > { %v1467_v56 = vld [vmem:[%s1717_s20 + $0x190] ss:$8 sps:$4 sm:$0xff]   ;;  %v1470_v58 = vld [vmem:[%s1717_s20 + $0x1a4] ss:$8 sps:$4 sm:$0xff]   ;;  %v1473_v60 = vld [vmem:[%s1717_s20 + $0x1a0] ss:$8 sps:$4 sm:$0xff]  }
  0x25   : > { %v1474_v61 = vld [vmem:[%s1717_s20 + $0xb4] ss:$8 sps:$4 sm:$0xff]   ;;  %v1478_v63 = vld [vmem:[%s1717_s20 + $0xb0] ss:$8 sps:$4 sm:$0xff]   ;;  %v1480_v1 = vld [vmem:[%s1717_s20 + $0xc4] ss:$8 sps:$4 sm:$0xff]  }
  0x26   : > { %730 = vmatpush1.bf16.msra.mxu0 %v1397_v7  ;;  %1356 = vmatpush1.bf16.msra.mxu1 %v1397_v7  ;;  %v1476_v62 = vld [vmem:[%s1717_s20 + $0x1b4] ss:$8 sps:$4 sm:$0xff]   ;;  %v1482_v2 = vld [vmem:[%s1717_s20 + $0x1c4] ss:$8 sps:$4 sm:$0xff]   ;;  %v1484_v3 = vld [vmem:[%s1717_s20 + $0xc0] ss:$8 sps:$4 sm:$0xff]  }
  0x27   : > { %731 = vmatprep.subr.bf16.mxu0 %v1656_v0  ;;  %1341 = vmatprep.subr.bf16.mxu1 %v1656_v0  ;;  %v1485_v4 = vld [vmem:[%s1717_s20 + $0x1c0] ss:$8 sps:$4 sm:$0xff]   ;;  %v1486_v5 = vld [vmem:[%s1717_s20 + $0xd4] ss:$8 sps:$4 sm:$0xff]   ;;  %v1490_v7 = vld [vmem:[%s1717_s20 + $0xd0] ss:$8 sps:$4 sm:$0xff]  }
  0x28   : > { %v1488_v6 = vld [vmem:[%s1717_s20 + $0x1d4] ss:$8 sps:$4 sm:$0xff]   ;;  %v1491_v8 = vld [vmem:[%s1717_s20 + $0x1d0] ss:$8 sps:$4 sm:$0xff]  }
  0x2a   : > { %732 = vmatpush1.bf16.msra.mxu0 %v1398_v9  ;;  %1357 = vmatpush1.bf16.msra.mxu1 %v1398_v9  ;;  %v1492_v9 = vld [vmem:[%s1717_s20 + $0xe4] ss:$8 sps:$4 sm:$0xff]  }
  0x2b   : > { %733 = vmatprep.subr.bf16.mxu0 %v1656_v0  ;;  %1342 = vmatprep.subr.bf16.mxu1 %v1656_v0 }
  0x2e   : > { %734 = vmatpush1.bf16.msra.mxu0 %v1399_v10  ;;  %1358 = vmatpush1.bf16.msra.mxu1 %v1399_v10  ;;  %v1494_v10 = vld [vmem:[%s1717_s20 + $0x1e4] ss:$8 sps:$4 sm:$0xff]  }
  0x2f   : > { %735 = vmatprep.subr.bf16.mxu0 %v1656_v0  ;;  %1343 = vmatprep.subr.bf16.mxu1 %v1656_v0 }
  0x32   : > { %736 = vmatpush1.bf16.msra.mxu0 %v1400_v11  ;;  %1359 = vmatpush1.bf16.msra.mxu1 %v1400_v11  ;;  %v1496_v11 = vld [vmem:[%s1717_s20 + $0xe0] ss:$8 sps:$4 sm:$0xff]  }
  0x33   : > { %737 = vmatprep.subr.bf16.mxu0 %v1656_v0  ;;  %1344 = vmatprep.subr.bf16.mxu1 %v1656_v0 }
  0x36   : > { %738 = vmatpush1.bf16.msra.mxu0 %v1401_v12  ;;  %1360 = vmatpush1.bf16.msra.mxu1 %v1401_v12  ;;  %v1497_v12 = vld [vmem:[%s1717_s20 + $0x1e0] ss:$8 sps:$4 sm:$0xff]  }
  0x37   : > { %739 = vmatprep.subr.bf16.mxu0 %v1656_v0  ;;  %1345 = vmatprep.subr.bf16.mxu1 %v1656_v0 }
  0x3a   : > { %740 = vmatpush1.bf16.msra.mxu0 %v1402_v13  ;;  %1361 = vmatpush1.bf16.msra.mxu1 %v1402_v13  ;;  %v1498_v13 = vld [vmem:[%s1717_s20 + $0xf4] ss:$8 sps:$4 sm:$0xff]  }
  0x3b   : > { %741 = vmatprep.subr.bf16.mxu0 %v1656_v0  ;;  %1346 = vmatprep.subr.bf16.mxu1 %v1656_v0 }
  0x3e   : > { %742 = vmatpush1.bf16.msra.mxu0 %v1403_v14  ;;  %1362 = vmatpush1.bf16.msra.mxu1 %v1403_v14  ;;  %v1500_v14 = vld [vmem:[%s1717_s20 + $0x1f4] ss:$8 sps:$4 sm:$0xff]  }
  0x3f   : > { %743 = vmatprep.subr.bf16.mxu0 %v1656_v0  ;;  %1347 = vmatprep.subr.bf16.mxu1 %v1656_v0 }
  0x42   : > { %744 = vmatpush1.bf16.msra.mxu0 %v1404_v15  ;;  %1363 = vmatpush1.bf16.msra.mxu1 %v1404_v15  ;;  %v1502_v15 = vld [vmem:[%s1717_s20 + $0xf0] ss:$8 sps:$4 sm:$0xff]  }
  0x43   : > { %745 = vmatprep.subr.bf16.mxu0 %v1656_v0  ;;  %1348 = vmatprep.subr.bf16.mxu1 %v1656_v0 }
  0x46   : > { %746 = vmatpush1.bf16.msra.mxu0 %v1405_v16  ;;  %1364 = vmatpush1.bf16.msra.mxu1 %v1405_v16  ;;  %v1503_v16 = vld [vmem:[%s1717_s20 + $0x1f0] ss:$8 sps:$4 sm:$0xff]  }
  0x47   : > { %747 = vmatprep.subr.bf16.mxu0 %v1656_v0  ;;  %1349 = vmatprep.subr.bf16.mxu1 %v1656_v0 }
  0x4a   : > { %748 = vmatpush1.bf16.msra.mxu0 %v1406_v17  ;;  %1365 = vmatpush1.bf16.msra.mxu1 %v1406_v17 }
  0x4b   : > { %749 = vmatprep.subr.bf16.mxu0 %v1656_v0  ;;  %1350 = vmatprep.subr.bf16.mxu1 %v1656_v0  ;;  %v1479_v0 = vld [vmem:[%s1717_s20 + $0x1b0] ss:$8 sps:$4 sm:$0xff]  }
  0x4e   : > { %750 = vmatpush1.bf16.msra.mxu0 %v1407_v18  ;;  %1366 = vmatpush1.bf16.msra.mxu1 %v1407_v18 }
  0x51   : > { %752 = vmatmul.mubr.bf16.vlgmr.msra.gmra.mrb[0].mxu0 %v1408_v19  ;;  %880 = vmatmul.mubr.bf16.vlgmr.msra.gmra.mrb[0].mxu1 %v1411_v20 }
  0x52   : > { %759 = vmatprep.mubr.bf16.mxu0 %v1414_v21  ;;  %887 = vmatprep.mubr.bf16.mxu1 %v1416_v22 }
  0x59   : > { %760 = vmatmul.mubr.bf16.gmra.mrb[4].mxu0 %v1418_v23  ;;  %888 = vmatmul.mubr.bf16.gmra.mrb[4].mxu1 %v1419_v24 }
  0x5a   : > { %767 = vmatprep.mubr.bf16.mxu0 %v1420_v25  ;;  %895 = vmatprep.mubr.bf16.mxu1 %v1422_v26 }
  0x61   : > { %768 = vmatmul.mubr.bf16.gmra.mrb[8].mxu0 %v1424_v27  ;;  %896 = vmatmul.mubr.bf16.gmra.mrb[8].mxu1 %v1425_v28 }
  0x62   : > { %775 = vmatprep.mubr.bf16.mxu0 %v1426_v29  ;;  %903 = vmatprep.mubr.bf16.mxu1 %v1428_v30 }
  0x69   : > { %776 = vmatmul.mubr.bf16.gmra.mrb[12].mxu0 %v1430_v31  ;;  %904 = vmatmul.mubr.bf16.gmra.mrb[12].mxu1 %v1431_v32 }
  0x6a   : > { %783 = vmatprep.mubr.bf16.mxu0 %v1432_v33  ;;  %911 = vmatprep.mubr.bf16.mxu1 %v1434_v34 }
  0x71   : > { %784 = vmatmul.mubr.bf16.gmra.mrb[16].mxu0 %v1436_v35  ;;  %912 = vmatmul.mubr.bf16.gmra.mrb[16].mxu1 %v1437_v36 }
  0x72   : > { %791 = vmatprep.mubr.bf16.mxu0 %v1438_v37  ;;  %919 = vmatprep.mubr.bf16.mxu1 %v1440_v38 }
  0x79   : > { %792 = vmatmul.mubr.bf16.gmra.mrb[20].mxu0 %v1442_v39  ;;  %920 = vmatmul.mubr.bf16.gmra.mrb[20].mxu1 %v1443_v40 }
  0x7a   : > { %799 = vmatprep.mubr.bf16.mxu0 %v1444_v41  ;;  %927 = vmatprep.mubr.bf16.mxu1 %v1446_v42 }
  0x81   : > { %800 = vmatmul.mubr.bf16.gmra.mrb[24].mxu0 %v1448_v43  ;;  %928 = vmatmul.mubr.bf16.gmra.mrb[24].mxu1 %v1449_v44 }
  0x82   : > { %807 = vmatprep.mubr.bf16.mxu0 %v1450_v45  ;;  %935 = vmatprep.mubr.bf16.mxu1 %v1452_v46 }
  0x89   : > { %808 = vmatmul.mubr.bf16.gmra.mrb[28].mxu0 %v1454_v47  ;;  %936 = vmatmul.mubr.bf16.gmra.mrb[28].mxu1 %v1455_v48 }
  0x8a   : > { %815 = vmatprep.mubr.bf16.mxu0 %v1456_v49  ;;  %943 = vmatprep.mubr.bf16.mxu1 %v1458_v50 }
  0x91   : > { %816 = vmatmul.mubr.bf16.gmra.mrb[32].mxu0 %v1460_v51  ;;  %944 = vmatmul.mubr.bf16.gmra.mrb[32].mxu1 %v1461_v52 }
  0x92   : > { %823 = vmatprep.mubr.bf16.mxu0 %v1462_v53  ;;  %951 = vmatprep.mubr.bf16.mxu1 %v1464_v54 }
  0x99   : > { %824 = vmatmul.mubr.bf16.gmra.mrb[36].mxu0 %v1466_v55  ;;  %952 = vmatmul.mubr.bf16.gmra.mrb[36].mxu1 %v1467_v56 }
  0x9a   : > { %831 = vmatprep.mubr.bf16.mxu0 %v1468_v57  ;;  %959 = vmatprep.mubr.bf16.mxu1 %v1470_v58 }
  0xa1   : > { %832 = vmatmul.mubr.bf16.gmra.mrb[40].mxu0 %v1472_v59  ;;  %960 = vmatmul.mubr.bf16.gmra.mrb[40].mxu1 %v1473_v60 }
  0xa2   : > { %839 = vmatprep.mubr.bf16.mxu0 %v1474_v61  ;;  %967 = vmatprep.mubr.bf16.mxu1 %v1476_v62 }
  0xa9   : > { %840 = vmatmul.mubr.bf16.gmra.mrb[44].mxu0 %v1478_v63  ;;  %968 = vmatmul.mubr.bf16.gmra.mrb[44].mxu1 %v1479_v0 }
  0xaa   : > { %847 = vmatprep.mubr.bf16.mxu0 %v1480_v1  ;;  %975 = vmatprep.mubr.bf16.mxu1 %v1482_v2 }
  0xb1   : > { %848 = vmatmul.mubr.bf16.gmra.mrb[48].mxu0 %v1484_v3  ;;  %976 = vmatmul.mubr.bf16.gmra.mrb[48].mxu1 %v1485_v4 }
  0xb2   : > { %855 = vmatprep.mubr.bf16.mxu0 %v1486_v5  ;;  %983 = vmatprep.mubr.bf16.mxu1 %v1488_v6 }
  0xb9   : > { %856 = vmatmul.mubr.bf16.gmra.mrb[52].mxu0 %v1490_v7  ;;  %984 = vmatmul.mubr.bf16.gmra.mrb[52].mxu1 %v1491_v8 }
  0xba   : > { %863 = vmatprep.mubr.bf16.mxu0 %v1492_v9  ;;  %991 = vmatprep.mubr.bf16.mxu1 %v1494_v10 }
  0xc1   : > { %864 = vmatmul.mubr.bf16.gmra.mrb[56].mxu0 %v1496_v11  ;;  %992 = vmatmul.mubr.bf16.gmra.mrb[56].mxu1 %v1497_v12 }
  0xc2   : > { %871 = vmatprep.mubr.bf16.mxu0 %v1498_v13  ;;  %999 = vmatprep.mubr.bf16.mxu1 %v1500_v14 }
  0xc9   : > { %872 = vmatmul.mubr.bf16.gmra.mrb[60].mxu0 %v1502_v15  ;;  %1000 = vmatmul.mubr.bf16.gmra.mrb[60].mxu1 %v1503_v16 }
 0x124   : > { %v753_v17 = vpop.f32.mrb[0].mxu0  ;;  %v881_v18 = vpop.f32.mrb[0].mxu1 }
 0x125   : > { %1504 = vtanh.f32 %v753_v17  ;;  %v755_v19 = vpop.f32.mrb[1].mxu0  ;;  %v883_v20 = vpop.f32.mrb[1].mxu1 }
 0x126   : > { %1506 = vtanh.f32 %v881_v18  ;;  %v756_v21 = vpop.f32.mrb[2].mxu0  ;;  %v884_v22 = vpop.f32.mrb[2].mxu1 }
 0x127   : > { %1508 = vtanh.f32 %v756_v21  ;;  %v758_v23 = vpop.f32.mrb[3].mxu0  ;;  %v886_v24 = vpop.f32.mrb[3].mxu1 }
 0x128   : > { %1510 = vtanh.f32 %v884_v22 }
 0x12c   : > { %v761_v25 = vpop.f32.mrb[4].mxu0  ;;  %v889_v26 = vpop.f32.mrb[4].mxu1 }
 0x12d   : > { %1512 = vtanh.f32 %v761_v25  ;;  %v763_v27 = vpop.f32.mrb[5].mxu0  ;;  %v891_v28 = vpop.f32.mrb[5].mxu1 }
 0x12e   : > { %1514 = vtanh.f32 %v889_v26  ;;  %v764_v29 = vpop.f32.mrb[6].mxu0  ;;  %v892_v30 = vpop.f32.mrb[6].mxu1 }
 0x12f   : > { %v1505_v31 = vpop.eup %1504  ;;  %1516 = vtanh.f32 %v764_v29  ;;  %v766_v32 = vpop.f32.mrb[7].mxu0 }
 0x130   : > { %v894_v33 = vpop.f32.mrb[7].mxu1  ;;  %v1507_v34 = vpop.eup %1506  ;;  %1073 = vst.msk [vmem:[%s1823_s23] sm:$0xff] %vm1072_vm0, %v1505_v31  ;;  %1518 = vtanh.f32 %v892_v30 }
 0x131   : > { %v1509_v35 = vpop.eup %1508  ;;  %1105 = vst.msk [vmem:[%s1823_s23 + $0x100] sm:$0xff] %vm1072_vm0, %v1507_v34 }
 0x132   : > { %v1511_v36 = vpop.eup %1510  ;;  %1074 = vst.msk [vmem:[%s1823_s23 + $0x8] sm:$0xff] %vm1072_vm0, %v1509_v35 }
 0x133   : > { %1106 = vst.msk [vmem:[%s1823_s23 + $0x108] sm:$0xff] %vm1072_vm0, %v1511_v36 }
 0x134   : > { %v769_v37 = vpop.f32.mrb[8].mxu0  ;;  %v897_v38 = vpop.f32.mrb[8].mxu1 }
 0x135   : > { %1520 = vtanh.f32 %v769_v37  ;;  %v771_v39 = vpop.f32.mrb[9].mxu0  ;;  %v899_v40 = vpop.f32.mrb[9].mxu1 }
 0x136   : > { %1522 = vtanh.f32 %v897_v38  ;;  %v772_v41 = vpop.f32.mrb[10].mxu0  ;;  %v900_v42 = vpop.f32.mrb[10].mxu1 }
 0x137   : > { %v1513_v43 = vpop.eup %1512  ;;  %1524 = vtanh.f32 %v772_v41  ;;  %v774_v44 = vpop.f32.mrb[11].mxu0 }
 0x138   : > { %v902_v45 = vpop.f32.mrb[11].mxu1  ;;  %v1515_v46 = vpop.eup %1514  ;;  %1075 = vst.msk [vmem:[%s1823_s23 + $0x10] sm:$0xff] %vm1072_vm0, %v1513_v43  ;;  %1526 = vtanh.f32 %v900_v42 }
 0x139   : > { %v1517_v47 = vpop.eup %1516  ;;  %1107 = vst.msk [vmem:[%s1823_s23 + $0x110] sm:$0xff] %vm1072_vm0, %v1515_v46 }
 0x13a   : > { %v1519_v48 = vpop.eup %1518  ;;  %1076 = vst.msk [vmem:[%s1823_s23 + $0x18] sm:$0xff] %vm1072_vm0, %v1517_v47 }
 0x13b   : > { %1108 = vst.msk [vmem:[%s1823_s23 + $0x118] sm:$0xff] %vm1072_vm0, %v1519_v48 }
 0x13c   : > { %v777_v49 = vpop.f32.mrb[12].mxu0  ;;  %v905_v50 = vpop.f32.mrb[12].mxu1 }
 0x13d   : > { %1528 = vtanh.f32 %v777_v49  ;;  %v779_v51 = vpop.f32.mrb[13].mxu0  ;;  %v907_v52 = vpop.f32.mrb[13].mxu1 }
 0x13e   : > { %1530 = vtanh.f32 %v905_v50  ;;  %v780_v53 = vpop.f32.mrb[14].mxu0  ;;  %v908_v54 = vpop.f32.mrb[14].mxu1 }
 0x13f   : > { %v1521_v55 = vpop.eup %1520  ;;  %1532 = vtanh.f32 %v780_v53  ;;  %v782_v56 = vpop.f32.mrb[15].mxu0 }
 0x140   : > { %v910_v57 = vpop.f32.mrb[15].mxu1  ;;  %v1523_v58 = vpop.eup %1522  ;;  %1077 = vst.msk [vmem:[%s1823_s23 + $0x20] sm:$0xff] %vm1072_vm0, %v1521_v55  ;;  %1534 = vtanh.f32 %v908_v54 }
 0x141   : > { %v1525_v59 = vpop.eup %1524  ;;  %1109 = vst.msk [vmem:[%s1823_s23 + $0x120] sm:$0xff] %vm1072_vm0, %v1523_v58 }
 0x142   : > { %v1527_v60 = vpop.eup %1526  ;;  %1078 = vst.msk [vmem:[%s1823_s23 + $0x28] sm:$0xff] %vm1072_vm0, %v1525_v59 }
 0x143   : > { %1110 = vst.msk [vmem:[%s1823_s23 + $0x128] sm:$0xff] %vm1072_vm0, %v1527_v60 }
 0x144   : > { %v785_v61 = vpop.f32.mrb[16].mxu0  ;;  %v913_v62 = vpop.f32.mrb[16].mxu1 }
 0x145   : > { %1536 = vtanh.f32 %v785_v61  ;;  %v787_v63 = vpop.f32.mrb[17].mxu0  ;;  %v915_v0 = vpop.f32.mrb[17].mxu1 }
 0x146   : > { %1538 = vtanh.f32 %v913_v62  ;;  %v788_v1 = vpop.f32.mrb[18].mxu0  ;;  %v916_v2 = vpop.f32.mrb[18].mxu1 }
 0x147   : > { %v1529_v3 = vpop.eup %1528  ;;  %1540 = vtanh.f32 %v788_v1  ;;  %v790_v4 = vpop.f32.mrb[19].mxu0 }
 0x148   : > { %v918_v5 = vpop.f32.mrb[19].mxu1  ;;  %v1531_v6 = vpop.eup %1530  ;;  %1079 = vst.msk [vmem:[%s1823_s23 + $0x30] sm:$0xff] %vm1072_vm0, %v1529_v3  ;;  %1542 = vtanh.f32 %v916_v2 }
 0x149   : > { %v1533_v7 = vpop.eup %1532  ;;  %1111 = vst.msk [vmem:[%s1823_s23 + $0x130] sm:$0xff] %vm1072_vm0, %v1531_v6 }
 0x14a   : > { %v1535_v8 = vpop.eup %1534  ;;  %1080 = vst.msk [vmem:[%s1823_s23 + $0x38] sm:$0xff] %vm1072_vm0, %v1533_v7 }
 0x14b   : > { %1112 = vst.msk [vmem:[%s1823_s23 + $0x138] sm:$0xff] %vm1072_vm0, %v1535_v8 }
 0x14c   : > { %v793_v9 = vpop.f32.mrb[20].mxu0  ;;  %v921_v10 = vpop.f32.mrb[20].mxu1 }
 0x14d   : > { %1544 = vtanh.f32 %v793_v9  ;;  %v795_v11 = vpop.f32.mrb[21].mxu0  ;;  %v923_v12 = vpop.f32.mrb[21].mxu1 }
 0x14e   : > { %1546 = vtanh.f32 %v921_v10  ;;  %v796_v13 = vpop.f32.mrb[22].mxu0  ;;  %v924_v14 = vpop.f32.mrb[22].mxu1 }
 0x14f   : > { %v1537_v15 = vpop.eup %1536  ;;  %1548 = vtanh.f32 %v796_v13  ;;  %v798_v16 = vpop.f32.mrb[23].mxu0 }
 0x150   : > { %v926_v17 = vpop.f32.mrb[23].mxu1  ;;  %v1539_v18 = vpop.eup %1538  ;;  %1081 = vst.msk [vmem:[%s1823_s23 + $0x40] sm:$0xff] %vm1072_vm0, %v1537_v15  ;;  %1550 = vtanh.f32 %v924_v14 }
 0x151   : > { %v1541_v19 = vpop.eup %1540  ;;  %1113 = vst.msk [vmem:[%s1823_s23 + $0x140] sm:$0xff] %vm1072_vm0, %v1539_v18 }
 0x152   : > { %v1543_v20 = vpop.eup %1542  ;;  %1082 = vst.msk [vmem:[%s1823_s23 + $0x48] sm:$0xff] %vm1072_vm0, %v1541_v19 }
 0x153   : > { %1114 = vst.msk [vmem:[%s1823_s23 + $0x148] sm:$0xff] %vm1072_vm0, %v1543_v20 }
 0x154   : > { %v801_v21 = vpop.f32.mrb[24].mxu0  ;;  %v929_v22 = vpop.f32.mrb[24].mxu1 }
 0x155   : > { %1552 = vtanh.f32 %v801_v21  ;;  %v803_v23 = vpop.f32.mrb[25].mxu0  ;;  %v931_v24 = vpop.f32.mrb[25].mxu1 }
 0x156   : > { %1554 = vtanh.f32 %v929_v22  ;;  %v804_v25 = vpop.f32.mrb[26].mxu0  ;;  %v932_v26 = vpop.f32.mrb[26].mxu1 }
 0x157   : > { %v1545_v27 = vpop.eup %1544  ;;  %1556 = vtanh.f32 %v804_v25  ;;  %v806_v28 = vpop.f32.mrb[27].mxu0 }
 0x158   : > { %v934_v29 = vpop.f32.mrb[27].mxu1  ;;  %v1547_v30 = vpop.eup %1546  ;;  %1083 = vst.msk [vmem:[%s1823_s23 + $0x50] sm:$0xff] %vm1072_vm0, %v1545_v27  ;;  %1558 = vtanh.f32 %v932_v26 }
 0x159   : > { %v1549_v31 = vpop.eup %1548  ;;  %1115 = vst.msk [vmem:[%s1823_s23 + $0x150] sm:$0xff] %vm1072_vm0, %v1547_v30 }
 0x15a   : > { %v1551_v32 = vpop.eup %1550  ;;  %1084 = vst.msk [vmem:[%s1823_s23 + $0x58] sm:$0xff] %vm1072_vm0, %v1549_v31 }
 0x15b   : > { %1116 = vst.msk [vmem:[%s1823_s23 + $0x158] sm:$0xff] %vm1072_vm0, %v1551_v32 }
 0x15c   : > { %v809_v33 = vpop.f32.mrb[28].mxu0  ;;  %v937_v34 = vpop.f32.mrb[28].mxu1 }
 0x15d   : > { %1560 = vtanh.f32 %v809_v33  ;;  %v811_v35 = vpop.f32.mrb[29].mxu0  ;;  %v939_v36 = vpop.f32.mrb[29].mxu1 }
 0x15e   : > { %1562 = vtanh.f32 %v937_v34  ;;  %v812_v37 = vpop.f32.mrb[30].mxu0  ;;  %v940_v38 = vpop.f32.mrb[30].mxu1 }
 0x15f   : > { %v1553_v39 = vpop.eup %1552  ;;  %1564 = vtanh.f32 %v812_v37  ;;  %v814_v40 = vpop.f32.mrb[31].mxu0 }
 0x160   : > { %v942_v41 = vpop.f32.mrb[31].mxu1  ;;  %v1555_v42 = vpop.eup %1554  ;;  %1085 = vst.msk [vmem:[%s1823_s23 + $0x60] sm:$0xff] %vm1072_vm0, %v1553_v39  ;;  %1566 = vtanh.f32 %v940_v38 }
 0x161   : > { %v1557_v43 = vpop.eup %1556  ;;  %1117 = vst.msk [vmem:[%s1823_s23 + $0x160] sm:$0xff] %vm1072_vm0, %v1555_v42 }
 0x162   : > { %v1559_v44 = vpop.eup %1558  ;;  %1086 = vst.msk [vmem:[%s1823_s23 + $0x68] sm:$0xff] %vm1072_vm0, %v1557_v43 }
 0x163   : > { %1118 = vst.msk [vmem:[%s1823_s23 + $0x168] sm:$0xff] %vm1072_vm0, %v1559_v44 }
 0x164   : > { %v817_v45 = vpop.f32.mrb[32].mxu0  ;;  %v945_v46 = vpop.f32.mrb[32].mxu1 }
 0x165   : > { %1568 = vtanh.f32 %v817_v45  ;;  %v819_v47 = vpop.f32.mrb[33].mxu0  ;;  %v947_v48 = vpop.f32.mrb[33].mxu1 }
 0x166   : > { %1570 = vtanh.f32 %v945_v46  ;;  %v820_v49 = vpop.f32.mrb[34].mxu0  ;;  %v948_v50 = vpop.f32.mrb[34].mxu1 }
 0x167   : > { %v1561_v51 = vpop.eup %1560  ;;  %1572 = vtanh.f32 %v820_v49  ;;  %v822_v52 = vpop.f32.mrb[35].mxu0 }
 0x168   : > { %v950_v53 = vpop.f32.mrb[35].mxu1  ;;  %v1563_v54 = vpop.eup %1562  ;;  %1087 = vst.msk [vmem:[%s1823_s23 + $0x70] sm:$0xff] %vm1072_vm0, %v1561_v51  ;;  %1574 = vtanh.f32 %v948_v50 }
 0x169   : > { %v1565_v55 = vpop.eup %1564  ;;  %1119 = vst.msk [vmem:[%s1823_s23 + $0x170] sm:$0xff] %vm1072_vm0, %v1563_v54 }
 0x16a   : > { %v1567_v56 = vpop.eup %1566  ;;  %1088 = vst.msk [vmem:[%s1823_s23 + $0x78] sm:$0xff] %vm1072_vm0, %v1565_v55 }
 0x16b   : > { %1120 = vst.msk [vmem:[%s1823_s23 + $0x178] sm:$0xff] %vm1072_vm0, %v1567_v56 }
 0x16c   : > { %v825_v57 = vpop.f32.mrb[36].mxu0  ;;  %v953_v58 = vpop.f32.mrb[36].mxu1 }
 0x16d   : > { %1576 = vtanh.f32 %v825_v57  ;;  %v827_v59 = vpop.f32.mrb[37].mxu0  ;;  %v955_v60 = vpop.f32.mrb[37].mxu1 }
 0x16e   : > { %1578 = vtanh.f32 %v953_v58  ;;  %v828_v61 = vpop.f32.mrb[38].mxu0  ;;  %v956_v62 = vpop.f32.mrb[38].mxu1 }
 0x16f   : > { %v1569_v63 = vpop.eup %1568  ;;  %1580 = vtanh.f32 %v828_v61  ;;  %v830_v0 = vpop.f32.mrb[39].mxu0 }
 0x170   : > { %v958_v1 = vpop.f32.mrb[39].mxu1  ;;  %v1571_v2 = vpop.eup %1570  ;;  %1089 = vst.msk [vmem:[%s1823_s23 + $0x80] sm:$0xff] %vm1072_vm0, %v1569_v63  ;;  %1582 = vtanh.f32 %v956_v62 }
 0x171   : > { %v1573_v3 = vpop.eup %1572  ;;  %1121 = vst.msk [vmem:[%s1823_s23 + $0x180] sm:$0xff] %vm1072_vm0, %v1571_v2 }
 0x172   : > { %v1575_v4 = vpop.eup %1574  ;;  %1090 = vst.msk [vmem:[%s1823_s23 + $0x88] sm:$0xff] %vm1072_vm0, %v1573_v3 }
 0x173   : > { %1122 = vst.msk [vmem:[%s1823_s23 + $0x188] sm:$0xff] %vm1072_vm0, %v1575_v4 }
 0x174   : > { %v833_v5 = vpop.f32.mrb[40].mxu0  ;;  %v961_v6 = vpop.f32.mrb[40].mxu1 }
 0x175   : > { %1584 = vtanh.f32 %v833_v5  ;;  %v835_v7 = vpop.f32.mrb[41].mxu0  ;;  %v963_v8 = vpop.f32.mrb[41].mxu1 }
 0x176   : > { %1586 = vtanh.f32 %v961_v6  ;;  %v836_v9 = vpop.f32.mrb[42].mxu0  ;;  %v964_v10 = vpop.f32.mrb[42].mxu1 }
 0x177   : > { %v1577_v11 = vpop.eup %1576  ;;  %1588 = vtanh.f32 %v836_v9  ;;  %v838_v12 = vpop.f32.mrb[43].mxu0 }
 0x178   : > { %v966_v13 = vpop.f32.mrb[43].mxu1  ;;  %v1579_v14 = vpop.eup %1578  ;;  %1091 = vst.msk [vmem:[%s1823_s23 + $0x90] sm:$0xff] %vm1072_vm0, %v1577_v11  ;;  %1590 = vtanh.f32 %v964_v10 }
 0x179   : > { %v1581_v15 = vpop.eup %1580  ;;  %1123 = vst.msk [vmem:[%s1823_s23 + $0x190] sm:$0xff] %vm1072_vm0, %v1579_v14 }
 0x17a   : > { %v1583_v16 = vpop.eup %1582  ;;  %1092 = vst.msk [vmem:[%s1823_s23 + $0x98] sm:$0xff] %vm1072_vm0, %v1581_v15 }
 0x17b   : > { %1124 = vst.msk [vmem:[%s1823_s23 + $0x198] sm:$0xff] %vm1072_vm0, %v1583_v16 }
 0x17c   : > { %v841_v17 = vpop.f32.mrb[44].mxu0  ;;  %v969_v18 = vpop.f32.mrb[44].mxu1 }
 0x17d   : > { %1592 = vtanh.f32 %v841_v17  ;;  %v843_v19 = vpop.f32.mrb[45].mxu0  ;;  %v971_v20 = vpop.f32.mrb[45].mxu1 }
 0x17e   : > { %1594 = vtanh.f32 %v969_v18  ;;  %v844_v21 = vpop.f32.mrb[46].mxu0  ;;  %v972_v22 = vpop.f32.mrb[46].mxu1 }
 0x17f   : > { %v1585_v23 = vpop.eup %1584  ;;  %1596 = vtanh.f32 %v844_v21  ;;  %v846_v24 = vpop.f32.mrb[47].mxu0 }
 0x180   : > { %v974_v25 = vpop.f32.mrb[47].mxu1  ;;  %v1587_v26 = vpop.eup %1586  ;;  %1093 = vst.msk [vmem:[%s1823_s23 + $0xa0] sm:$0xff] %vm1072_vm0, %v1585_v23  ;;  %1598 = vtanh.f32 %v972_v22 }
 0x181   : > { %v1589_v27 = vpop.eup %1588  ;;  %1125 = vst.msk [vmem:[%s1823_s23 + $0x1a0] sm:$0xff] %vm1072_vm0, %v1587_v26 }
 0x182   : > { %v1591_v28 = vpop.eup %1590  ;;  %1094 = vst.msk [vmem:[%s1823_s23 + $0xa8] sm:$0xff] %vm1072_vm0, %v1589_v27 }
 0x183   : > { %1126 = vst.msk [vmem:[%s1823_s23 + $0x1a8] sm:$0xff] %vm1072_vm0, %v1591_v28 }
 0x184   : > { %v849_v29 = vpop.f32.mrb[48].mxu0  ;;  %v977_v30 = vpop.f32.mrb[48].mxu1 }
 0x185   : > { %1600 = vtanh.f32 %v849_v29  ;;  %v851_v31 = vpop.f32.mrb[49].mxu0  ;;  %v979_v32 = vpop.f32.mrb[49].mxu1 }
 0x186   : > { %1602 = vtanh.f32 %v977_v30  ;;  %v852_v33 = vpop.f32.mrb[50].mxu0  ;;  %v980_v34 = vpop.f32.mrb[50].mxu1 }
 0x187   : > { %v1593_v35 = vpop.eup %1592  ;;  %1604 = vtanh.f32 %v852_v33  ;;  %v854_v36 = vpop.f32.mrb[51].mxu0 }
 0x188   : > { %v982_v37 = vpop.f32.mrb[51].mxu1  ;;  %v1595_v38 = vpop.eup %1594  ;;  %1095 = vst.msk [vmem:[%s1823_s23 + $0xb0] sm:$0xff] %vm1072_vm0, %v1593_v35  ;;  %1606 = vtanh.f32 %v980_v34 }
 0x189   : > { %v1597_v39 = vpop.eup %1596  ;;  %1127 = vst.msk [vmem:[%s1823_s23 + $0x1b0] sm:$0xff] %vm1072_vm0, %v1595_v38 }
 0x18a   : > { %v1599_v40 = vpop.eup %1598  ;;  %1096 = vst.msk [vmem:[%s1823_s23 + $0xb8] sm:$0xff] %vm1072_vm0, %v1597_v39 }
 0x18b   : > { %1128 = vst.msk [vmem:[%s1823_s23 + $0x1b8] sm:$0xff] %vm1072_vm0, %v1599_v40 }
 0x18c   : > { %v857_v41 = vpop.f32.mrb[52].mxu0  ;;  %v985_v42 = vpop.f32.mrb[52].mxu1 }
 0x18d   : > { %1608 = vtanh.f32 %v857_v41  ;;  %v859_v43 = vpop.f32.mrb[53].mxu0  ;;  %v987_v44 = vpop.f32.mrb[53].mxu1 }
 0x18e   : > { %1610 = vtanh.f32 %v985_v42  ;;  %v860_v45 = vpop.f32.mrb[54].mxu0  ;;  %v988_v46 = vpop.f32.mrb[54].mxu1 }
 0x18f   : > { %v1601_v47 = vpop.eup %1600  ;;  %1612 = vtanh.f32 %v860_v45  ;;  %v862_v48 = vpop.f32.mrb[55].mxu0 }
 0x190   : > { %v990_v49 = vpop.f32.mrb[55].mxu1  ;;  %v1603_v50 = vpop.eup %1602  ;;  %1097 = vst.msk [vmem:[%s1823_s23 + $0xc0] sm:$0xff] %vm1072_vm0, %v1601_v47  ;;  %1614 = vtanh.f32 %v988_v46 }
 0x191   : > { %v1605_v51 = vpop.eup %1604  ;;  %1129 = vst.msk [vmem:[%s1823_s23 + $0x1c0] sm:$0xff] %vm1072_vm0, %v1603_v50 }
 0x192   : > { %v1607_v52 = vpop.eup %1606  ;;  %1098 = vst.msk [vmem:[%s1823_s23 + $0xc8] sm:$0xff] %vm1072_vm0, %v1605_v51 }
 0x193   : > { %1130 = vst.msk [vmem:[%s1823_s23 + $0x1c8] sm:$0xff] %vm1072_vm0, %v1607_v52 }
 0x194   : > { %v865_v53 = vpop.f32.mrb[56].mxu0  ;;  %v993_v54 = vpop.f32.mrb[56].mxu1 }
 0x195   : > { %1616 = vtanh.f32 %v865_v53  ;;  %v867_v55 = vpop.f32.mrb[57].mxu0  ;;  %v995_v56 = vpop.f32.mrb[57].mxu1 }
 0x196   : > { %1618 = vtanh.f32 %v993_v54  ;;  %v868_v57 = vpop.f32.mrb[58].mxu0  ;;  %v996_v58 = vpop.f32.mrb[58].mxu1 }
 0x197   : > { %v1609_v59 = vpop.eup %1608  ;;  %1620 = vtanh.f32 %v868_v57  ;;  %v870_v60 = vpop.f32.mrb[59].mxu0 }
 0x198   : > { %v998_v61 = vpop.f32.mrb[59].mxu1  ;;  %v1611_v62 = vpop.eup %1610  ;;  %1099 = vst.msk [vmem:[%s1823_s23 + $0xd0] sm:$0xff] %vm1072_vm0, %v1609_v59  ;;  %1622 = vtanh.f32 %v996_v58 }
 0x199   : > { %v1613_v63 = vpop.eup %1612  ;;  %1131 = vst.msk [vmem:[%s1823_s23 + $0x1d0] sm:$0xff] %vm1072_vm0, %v1611_v62 }
 0x19a   : > { %v1615_v0 = vpop.eup %1614  ;;  %1100 = vst.msk [vmem:[%s1823_s23 + $0xd8] sm:$0xff] %vm1072_vm0, %v1613_v63 }
 0x19b   : > { %1132 = vst.msk [vmem:[%s1823_s23 + $0x1d8] sm:$0xff] %vm1072_vm0, %v1615_v0 }
 0x19c   : > { %v873_v1 = vpop.f32.mrb[60].mxu0  ;;  %v1001_v2 = vpop.f32.mrb[60].mxu1 }
 0x19d   : > { %1624 = vtanh.f32 %v873_v1  ;;  %v875_v3 = vpop.f32.mrb[61].mxu0  ;;  %v1003_v4 = vpop.f32.mrb[61].mxu1 }
 0x19e   : > { %1626 = vtanh.f32 %v1001_v2  ;;  %v876_v5 = vpop.f32.mrb[62].mxu0  ;;  %v1004_v6 = vpop.f32.mrb[62].mxu1 }
 0x19f   : > { %v1617_v7 = vpop.eup %1616  ;;  %1628 = vtanh.f32 %v876_v5  ;;  %v878_v8 = vpop.f32.mrb[63].mxu0 }
 0x1a0   : > { %v1006_v9 = vpop.f32.mrb[63].mxu1  ;;  %v1619_v10 = vpop.eup %1618  ;;  %1101 = vst.msk [vmem:[%s1823_s23 + $0xe0] sm:$0xff] %vm1072_vm0, %v1617_v7  ;;  %1630 = vtanh.f32 %v1004_v6 }
 0x1a1   : > { %v1621_v11 = vpop.eup %1620  ;;  %1133 = vst.msk [vmem:[%s1823_s23 + $0x1e0] sm:$0xff] %vm1072_vm0, %v1619_v10 }
 0x1a2   : > { %v1623_v12 = vpop.eup %1622  ;;  %1102 = vst.msk [vmem:[%s1823_s23 + $0xe8] sm:$0xff] %vm1072_vm0, %v1621_v11 }
 0x1a3   : > { %1134 = vst.msk [vmem:[%s1823_s23 + $0x1e8] sm:$0xff] %vm1072_vm0, %v1623_v12 }
 0x1a7   : > { %v1625_v13 = vpop.eup %1624 }
 0x1a8   : > { %v1627_v14 = vpop.eup %1626  ;;  %1103 = vst.msk [vmem:[%s1823_s23 + $0xf0] sm:$0xff] %vm1072_vm0, %v1625_v13 }
 0x1a9   : > { %v1629_v15 = vpop.eup %1628  ;;  %1135 = vst.msk [vmem:[%s1823_s23 + $0x1f0] sm:$0xff] %vm1072_vm0, %v1627_v14 }
 0x1aa   : > { %v1631_v16 = vpop.eup %1630  ;;  %1104 = vst.msk [vmem:[%s1823_s23 + $0xf8] sm:$0xff] %vm1072_vm0, %v1629_v15 }
 0x1ab   : > { %1136 = vst.msk [vmem:[%s1823_s23 + $0x1f8] sm:$0xff] %vm1072_vm0, %v1631_v16 }
 0x1ac PF: > { %s12_s11 = sadd.s32 1, %s1654_s11   ;;  %s1965_s9 = smov %s1650_s10 }
 0x1ad   : > { %p9_p5 = scmp.ge.s32.totalorder %s12_s11, 6   ;;  %s1966_s10 = smov %s1968_s12 }
 0x1af   :  { %11 = sbr.rel (!%p9_p5) target bundleno = 2 (0x2), region = 61 }

</bundles_post_ra>
